<compile_context>
chip_gen: v7x
topology: tpu7x:2x2x1
jax: 0.10.0
libtpu: 0.0.40
codegen_flags: <defaults>
</compile_context>

<pallas_src>
import functools
import numpy as np
import jax
import jax.numpy as jnp
from jax import lax
from jax.experimental import pallas as pl
from jax.experimental.pallas import tpu as pltpu

BN_EPS = 1e-5


def _self_attention_kernel(value_channels,
                           xp_ref, wc_ref, bc_ref, wv2_ref, bv2_ref,
                           ctx_ref, sim_ref,
                           feat_sc, v_sc):
    """One (batch, query-tile) grid step.

    xp_ref  : (HW, 9*Cin)        im2col patches (all keys of this batch)
    wc_ref  : (9*Cin, Vc+Kc)     fused [value-conv1 | key-conv] weight
    bc_ref  : (1, Vc+Kc)
    wv2_ref : (Vc, Vc)
    bv2_ref : (1, Vc)
    ctx_ref : (Vc, TQ)           context, transposed (lane-dense store)
    sim_ref : (TQ, HW)
    feat_sc : (HW, Kc) bf16      key/query features (computed at qi == 0)
    v_sc    : (HW, Vc) bf16      value features     (computed at qi == 0)
    """
    qi = pl.program_id(1)
    tq = sim_ref.shape[0]
    vc = value_channels

    # Compute key/query features and values once per batch (first query tile).
    # BN scale and Kc**-0.25 are already folded into the key columns of wc/bc.
    @pl.when(qi == 0)
    def _():
        comb = jnp.dot(xp_ref[...], wc_ref[...],
                       preferred_element_type=jnp.float32) + bc_ref[...]
        comb = jnp.maximum(comb, 0.0)                       # ReLU (both paths)
        v1 = comb[:, :vc]                                   # (HW, Vc)
        feat = comb[:, vc:]                                 # (HW, Kc)
        v = jnp.dot(v1, wv2_ref[...],
                    preferred_element_type=jnp.float32) + bv2_ref[...]
        v = jnp.maximum(v, 0.0)                             # (HW, Vc)
        feat_sc[...] = feat.astype(feat_sc.dtype)
        v_sc[...] = v.astype(v_sc.dtype)

    q0 = pl.multiple_of(qi * tq, tq)
    feat_q = feat_sc[pl.ds(q0, tq), :]                      # (TQ, Kc) bf16

    # sim = softmax(query @ key^T)   (scales pre-folded into the key weight)
    sim = lax.dot_general(feat_q, feat_sc[...],
                          dimension_numbers=(((1,), (1,)), ((), ())),
                          preferred_element_type=jnp.float32)     # (TQ, HW)
    sim = jnp.exp(sim - jnp.max(sim, axis=-1, keepdims=True))
    inv = pl.reciprocal(jnp.sum(sim, axis=-1, keepdims=True), approx=True)
    sim = sim * inv

    # context^T = value^T @ sim^T  -> (Vc, TQ); lane dim is the HW tile.
    ctx_t = lax.dot_general(v_sc[...], sim.astype(v_sc.dtype),
                            dimension_numbers=(((0,), (1,)), ((), ())),
                            preferred_element_type=jnp.float32)

    sim_ref[...] = sim
    ctx_ref[...] = ctx_t.astype(ctx_ref.dtype)


def init_params(key, in_channels, key_channels, value_channels):
    k1, k2, k3 = jax.random.split(key, 3)
    # Kaiming-normal (fan_in, nonlinearity='relu'): std = sqrt(2 / fan_in)
    wk_t = jax.random.normal(k1, (key_channels, in_channels, 1, 1),
                             dtype=jnp.float32) * np.sqrt(2.0 / (in_channels * 1 * 1))
    wv1_t = jax.random.normal(k2, (value_channels, in_channels, 3, 3),
                              dtype=jnp.float32) * np.sqrt(2.0 / (in_channels * 9))
    wv2_t = jax.random.normal(k3, (value_channels, value_channels, 1, 1),
                              dtype=jnp.float32) * np.sqrt(2.0 / (value_channels * 1 * 1))
    # rearrange into matmul-ready form
    wk = wk_t[:, :, 0, 0].T                                               # (Cin, Kc)
    wv1 = jnp.transpose(wv1_t, (2, 3, 1, 0)).reshape(9 * in_channels,
                                                     value_channels)      # (9*Cin, Vc)
    wv2 = wv2_t[:, :, 0, 0].T                                             # (Vc, Vc)
    bk = jnp.zeros((1, key_channels), jnp.float32)
    bv1 = jnp.zeros((1, value_channels), jnp.float32)
    bv2 = jnp.zeros((1, value_channels), jnp.float32)
    return (wk, bk, wv1, bv1, wv2, bv2)


def _im2col_3x3(x_nhwc):
    B, H, W, C = x_nhwc.shape
    xpad = jnp.pad(x_nhwc, ((0, 0), (1, 1), (1, 1), (0, 0)))
    patches = [xpad[:, dh:dh + H, dw:dw + W, :]
               for dh in range(3) for dw in range(3)]
    return jnp.concatenate(patches, axis=-1).reshape(B, H * W, 9 * C)


def self_attention_block(x_nchw, params, key_channels, value_channels, *, tq=None):
    B, C, H, W = x_nchw.shape
    HW = H * W
    x_nhwc = jnp.transpose(x_nchw, (0, 2, 3, 1)).astype(jnp.float32)
    x_patch = _im2col_3x3(x_nhwc)                # centre tap == x itself

    wk, bk, wv1, bv1, wv2, bv2 = params

    # Fold inference-mode BN (mean=0, var=1, gamma=1, beta=0) and the
    # Kc**-0.5 attention scale (Kc**-0.25 per operand) into the key conv.
    s = (key_channels ** -0.25) / np.sqrt(1.0 + BN_EPS)
    wk_s = wk * s
    bk_s = bk * s

    # Fuse the key 1x1 conv into the im2col matmul:
    # x_flat == x_patch[..., 4C:5C], so place wk at rows [4C:5C).
    wk_rows = jnp.zeros((9 * C, key_channels), jnp.float32)
    wk_rows = wk_rows.at[4 * C:5 * C, :].set(wk_s)
    w_comb = jnp.concatenate([wv1, wk_rows], axis=1)      # (9C, Vc+Kc)
    b_comb = jnp.concatenate([bv1, bk_s], axis=1)         # (1, Vc+Kc)

    if tq is None:
        tq = min(128, HW)
    assert HW % tq == 0, "query tile must divide H*W"
    n_q = HW // tq

    kernel = functools.partial(_self_attention_kernel, value_channels)

    ctx_t, sim = pl.pallas_call(
        kernel,
        out_shape=(jax.ShapeDtypeStruct((B, value_channels, HW), jnp.float32),
                   jax.ShapeDtypeStruct((B, HW, HW), jnp.float32)),
        grid_spec=pltpu.PrefetchScalarGridSpec(
            num_scalar_prefetch=0,
            grid=(B, n_q),
            in_specs=[
                pl.BlockSpec((None, HW, 9 * C), lambda b, q: (b, 0, 0)),
                pl.BlockSpec((9 * C, value_channels + key_channels),
                             lambda b, q: (0, 0)),
                pl.BlockSpec((1, value_channels + key_channels),
                             lambda b, q: (0, 0)),
                pl.BlockSpec((value_channels, value_channels),
                             lambda b, q: (0, 0)),
                pl.BlockSpec((1, value_channels), lambda b, q: (0, 0)),
            ],
            out_specs=[
                pl.BlockSpec((None, value_channels, tq), lambda b, q: (b, 0, q)),
                pl.BlockSpec((None, tq, HW), lambda b, q: (b, q, 0)),
            ],
            scratch_shapes=[
                pltpu.VMEM((HW, key_channels), jnp.bfloat16),
                pltpu.VMEM((HW, value_channels), jnp.bfloat16),
            ],
        ),
        compiler_params=pltpu.CompilerParams(
            dimension_semantics=("parallel", "arbitrary"),
            vmem_limit_bytes=64 * 1024 * 1024),
    )(x_patch, w_comb, b_comb, wv2, bv2)

    # context^T (B, Vc, HW) -> (B, Vc, H, W): reshape only, no transpose.
    context = ctx_t.reshape(B, value_channels, H, W)
    return context, sim


def reference(x_nchw, params, key_channels, value_channels):
    """Pure-JAX f32 reference of the original (unfused, unscaled-weights) math."""
    wk, bk, wv1, bv1, wv2, bv2 = params
    B, C, H, W = x_nchw.shape
    HW = H * W
    x_nhwc = jnp.transpose(x_nchw, (0, 2, 3, 1)).astype(jnp.float32)
    x_flat = x_nhwc.reshape(B, HW, C)
    x_patch = _im2col_3x3(x_nhwc)

    feat = jnp.einsum('bnc,ck->bnk', x_flat, wk) + bk
    feat = jnp.maximum(feat / np.sqrt(1.0 + BN_EPS), 0.0)
    sim = jnp.einsum('bnk,bmk->bnm', feat, feat) * (key_channels ** -0.5)
    sim = jax.nn.softmax(sim, axis=-1)
    v = jnp.maximum(jnp.einsum('bnp,pv->bnv', x_patch, wv1) + bv1, 0.0)
    v = jnp.maximum(jnp.einsum('bnv,vw->bnw', v, wv2) + bv2, 0.0)
    ctx = jnp.einsum('bnm,bmv->bnv', sim, v)
    context = jnp.transpose(ctx, (0, 2, 1)).reshape(B, value_channels, H, W)
    return context, sim


if __name__ == "__main__":
    in_channels, key_channels, value_channels = 4, 32, 32
    B, H, W = 2, 16, 16

    root = jax.random.PRNGKey(0)
    kx, kp = jax.random.split(root)
    x = jax.random.normal(kx, (B, in_channels, H, W), dtype=jnp.float32)
    params = init_params(kp, in_channels, key_channels, value_channels)

    context, sim_map = self_attention_block(x, params, key_channels, value_channels)
    jax.block_until_ready((context, sim_map))

    # Tolerances account for bf16 MXU operands + approx reciprocal in-kernel
    # versus the exact f32 reference.
    ctx_ref, sim_ref = reference(x, params, key_channels, value_channels)
    np.testing.assert_allclose(np.asarray(sim_map), np.asarray(sim_ref),
                               rtol=1e-1, atol=1e-3)
    np.testing.assert_allclose(np.asarray(context), np.asarray(ctx_ref),
                               rtol=1e-1, atol=3e-2)

    assert context.shape == (B, value_channels, H, W)
    assert sim_map.shape == (B, H * W, H * W)
    print("KERNEL_OK")
</pallas_src>

<mosaic_0001>
module attributes {stable_mosaic.version = 11 : i64} {
  func.func @_self_attention_kernel(%arg0: i32, %arg1: i32, %arg2: memref<1x256x36xf32, #tpu.memory_space<vmem>>, %arg3: memref<36x64xf32, #tpu.memory_space<vmem>>, %arg4: memref<1x64xf32, #tpu.memory_space<vmem>>, %arg5: memref<32x32xf32, #tpu.memory_space<vmem>>, %arg6: memref<1x32xf32, #tpu.memory_space<vmem>>, %arg7: memref<1x32x128xf32, #tpu.memory_space<vmem>>, %arg8: memref<1x128x256xf32, #tpu.memory_space<vmem>>, %arg9: memref<256x32xbf16, #tpu.memory_space<vmem>>, %arg10: memref<256x32xbf16, #tpu.memory_space<vmem>>) attributes {dimension_semantics = [#tpu.dimension_semantics<parallel>, #tpu.dimension_semantics<arbitrary>], iteration_bounds = array<i64: 2, 2>, scalar_prefetch = 0 : i64, scratch_operands = 2 : i64, tpu.core_type = #tpu.core_type<tc>, window_params = [{transform_indices = @transform_0, window_bounds = array<i64: 1, 256, 36>}, {pipeline_mode = #tpu.pipeline_mode<synchronous>, transform_indices = @transform_1, window_bounds = array<i64: 36, 64>}, {pipeline_mode = #tpu.pipeline_mode<synchronous>, transform_indices = @transform_2, window_bounds = array<i64: 1, 64>}, {pipeline_mode = #tpu.pipeline_mode<synchronous>, transform_indices = @transform_3, window_bounds = array<i64: 32, 32>}, {pipeline_mode = #tpu.pipeline_mode<synchronous>, transform_indices = @transform_4, window_bounds = array<i64: 1, 32>}, {transform_indices = @transform_5, window_bounds = array<i64: 1, 32, 128>}, {transform_indices = @transform_6, window_bounds = array<i64: 1, 128, 256>}]} {
    %c0_i32 = arith.constant 0 : i32
    %0 = arith.cmpi eq, %arg1, %c0_i32 : i32
    %1 = arith.extui %0 : i1 to i32
    %c0_i32_0 = arith.constant 0 : i32
    %2 = arith.cmpi ne, %1, %c0_i32_0 : i32
    scf.if %2 {
      %c0_14 = arith.constant 0 : index
      %c0_15 = arith.constant 0 : index
      %c0_16 = arith.constant 0 : index
      %28 = vector.load %arg2[%c0_14, %c0_15, %c0_16] : memref<1x256x36xf32, #tpu.memory_space<vmem>>, vector<1x256x36xf32>
      %29 = vector.shape_cast %28 : vector<1x256x36xf32> to vector<256x36xf32>
      %c0_17 = arith.constant 0 : index
      %c0_18 = arith.constant 0 : index
      %30 = vector.load %arg3[%c0_17, %c0_18] : memref<36x64xf32, #tpu.memory_space<vmem>>, vector<36x64xf32>
      %cst_19 = arith.constant dense<0.000000e+00> : vector<256x64xf32>
      %31 = tpu.matmul %29, %30, %cst_19 {dimension_numbers = #tpu.dot_dimension_numbers<[1], [0], [0], [1], [0, 0, 1, 1], [], []>} : vector<256x36xf32>, vector<36x64xf32>, vector<256x64xf32> -> vector<256x64xf32>
      %c0_20 = arith.constant 0 : index
      %c0_21 = arith.constant 0 : index
      %32 = vector.load %arg4[%c0_20, %c0_21] : memref<1x64xf32, #tpu.memory_space<vmem>>, vector<1x64xf32>
      %33 = vector.broadcast %32 : vector<1x64xf32> to vector<256x64xf32>
      %34 = arith.addf %31, %33 : vector<256x64xf32>
      %cst_22 = arith.constant 0.000000e+00 : f32
      %35 = vector.broadcast %cst_22 : f32 to vector<256x64xf32>
      %36 = arith.maximumf %34, %35 : vector<256x64xf32>
      %37 = vector.extract_strided_slice %36 {offsets = [0, 0], sizes = [256, 32], strides = [1, 1]} : vector<256x64xf32> to vector<256x32xf32>
      %38 = vector.extract_strided_slice %36 {offsets = [0, 32], sizes = [256, 32], strides = [1, 1]} : vector<256x64xf32> to vector<256x32xf32>
      %c0_23 = arith.constant 0 : index
      %c0_24 = arith.constant 0 : index
      %39 = vector.load %arg5[%c0_23, %c0_24] : memref<32x32xf32, #tpu.memory_space<vmem>>, vector<32x32xf32>
      %cst_25 = arith.constant dense<0.000000e+00> : vector<256x32xf32>
      %40 = tpu.matmul %37, %39, %cst_25 {dimension_numbers = #tpu.dot_dimension_numbers<[1], [0], [0], [1], [0, 0, 1, 1], [], []>} : vector<256x32xf32>, vector<32x32xf32>, vector<256x32xf32> -> vector<256x32xf32>
      %c0_26 = arith.constant 0 : index
      %c0_27 = arith.constant 0 : index
      %41 = vector.load %arg6[%c0_26, %c0_27] : memref<1x32xf32, #tpu.memory_space<vmem>>, vector<1x32xf32>
      %42 = vector.broadcast %41 : vector<1x32xf32> to vector<256x32xf32>
      %43 = arith.addf %40, %42 : vector<256x32xf32>
      %cst_28 = arith.constant 0.000000e+00 : f32
      %44 = vector.broadcast %cst_28 : f32 to vector<256x32xf32>
      %45 = arith.maximumf %43, %44 : vector<256x32xf32>
      %46 = arith.truncf %38 : vector<256x32xf32> to vector<256x32xbf16>
      %c0_29 = arith.constant 0 : index
      %c0_30 = arith.constant 0 : index
      %47 = vector.load %arg9[%c0_29, %c0_30] : memref<256x32xbf16, #tpu.memory_space<vmem>>, vector<256x32xbf16>
      tpu.vector_store %arg9[%c0_29, %c0_30], %46 {strides = array<i32>} : memref<256x32xbf16, #tpu.memory_space<vmem>>, vector<256x32xbf16>,
      %48 = arith.truncf %45 : vector<256x32xf32> to vector<256x32xbf16>
      %c0_31 = arith.constant 0 : index
      %c0_32 = arith.constant 0 : index
      %49 = vector.load %arg10[%c0_31, %c0_32] : memref<256x32xbf16, #tpu.memory_space<vmem>>, vector<256x32xbf16>
      tpu.vector_store %arg10[%c0_31, %c0_32], %48 {strides = array<i32>} : memref<256x32xbf16, #tpu.memory_space<vmem>>, vector<256x32xbf16>,
    } else {
    }
    %c128_i32 = arith.constant 128 : i32
    %3 = arith.muli %arg1, %c128_i32 : i32
    %4 = tpu.assume_multiple %3, 128 : i32
    %5 = arith.index_cast %4 : i32 to index
    %c0 = arith.constant 0 : index
    %6 = vector.load %arg9[%5, %c0] : memref<256x32xbf16, #tpu.memory_space<vmem>>, vector<128x32xbf16>
    %c0_1 = arith.constant 0 : index
    %c0_2 = arith.constant 0 : index
    %7 = vector.load %arg9[%c0_1, %c0_2] : memref<256x32xbf16, #tpu.memory_space<vmem>>, vector<256x32xbf16>
    %cst = arith.constant dense<0.000000e+00> : vector<128x256xf32>
    %8 = tpu.matmul %6, %7, %cst {dimension_numbers = #tpu.dot_dimension_numbers<[1], [1], [0], [0], [0, 0, 1, 0], [], []>} : vector<128x32xbf16>, vector<256x32xbf16>, vector<128x256xf32> -> vector<128x256xf32>
    %cst_3 = arith.constant dense<0xFF800000> : vector<128xf32>
    %9 = vector.multi_reduction <maximumf>, %8, %cst_3 [1] : vector<128x256xf32> to vector<128xf32>
    %10 = vector.shape_cast %9 : vector<128xf32> to vector<128x1xf32>
    %11 = vector.broadcast %10 : vector<128x1xf32> to vector<128x256xf32>
    %12 = arith.subf %8, %11 : vector<128x256xf32>
    %13 = math.exp %12 : vector<128x256xf32>
    %cst_4 = arith.constant dense<0.000000e+00> : vector<128xf32>
    %14 = vector.multi_reduction <add>, %13, %cst_4 [1] : vector<128x256xf32> to vector<128xf32>
    %15 = vector.shape_cast %14 : vector<128xf32> to vector<128x1xf32>
    %16 = tpu.reciprocal %15 {approx = true} : vector<128x1xf32> -> vector<128x1xf32>
    %17 = vector.broadcast %16 : vector<128x1xf32> to vector<128x256xf32>
    %18 = arith.mulf %13, %17 : vector<128x256xf32>
    %c0_5 = arith.constant 0 : index
    %c0_6 = arith.constant 0 : index
    %19 = vector.load %arg10[%c0_5, %c0_6] : memref<256x32xbf16, #tpu.memory_space<vmem>>, vector<256x32xbf16>
    %20 = arith.truncf %18 : vector<128x256xf32> to vector<128x256xbf16>
    %cst_7 = arith.constant dense<0.000000e+00> : vector<32x128xf32>
    %21 = tpu.matmul %19, %20, %cst_7 {dimension_numbers = #tpu.dot_dimension_numbers<[0], [1], [1], [0], [0, 1, 1, 0], [], []>} : vector<256x32xbf16>, vector<128x256xbf16>, vector<32x128xf32> -> vector<32x128xf32>
    %c0_8 = arith.constant 0 : index
    %c0_9 = arith.constant 0 : index
    %c0_10 = arith.constant 0 : index
    %22 = vector.load %arg8[%c0_8, %c0_9, %c0_10] : memref<1x128x256xf32, #tpu.memory_space<vmem>>, vector<1x128x256xf32>
    %23 = vector.shape_cast %22 : vector<1x128x256xf32> to vector<128x256xf32>
    %24 = vector.shape_cast %18 : vector<128x256xf32> to vector<1x128x256xf32>
    tpu.vector_store %arg8[%c0_8, %c0_9, %c0_10], %24 {strides = array<i32>} : memref<1x128x256xf32, #tpu.memory_space<vmem>>, vector<1x128x256xf32>,
    %c0_11 = arith.constant 0 : index
    %c0_12 = arith.constant 0 : index
    %c0_13 = arith.constant 0 : index
    %25 = vector.load %arg7[%c0_11, %c0_12, %c0_13] : memref<1x32x128xf32, #tpu.memory_space<vmem>>, vector<1x32x128xf32>
    %26 = vector.shape_cast %25 : vector<1x32x128xf32> to vector<32x128xf32>
    %27 = vector.shape_cast %21 : vector<32x128xf32> to vector<1x32x128xf32>
    tpu.vector_store %arg7[%c0_11, %c0_12, %c0_13], %27 {strides = array<i32>} : memref<1x32x128xf32, #tpu.memory_space<vmem>>, vector<1x32x128xf32>,
    return
  }
  func.func @transform_0(%arg0: i32, %arg1: i32) -> (i32, i32, i32) {
    %c0_i32 = arith.constant 0 : i32
    %c0_i32_0 = arith.constant 0 : i32
    %c0_i32_1 = arith.constant 0 : i32
    return %arg0, %c0_i32, %c0_i32_0 : i32, i32, i32
  }
  func.func @transform_1(%arg0: i32, %arg1: i32) -> (i32, i32) {
    %c0_i32 = arith.constant 0 : i32
    %c0_i32_0 = arith.constant 0 : i32
    %c0_i32_1 = arith.constant 0 : i32
    return %c0_i32, %c0_i32_0 : i32, i32
  }
  func.func @transform_2(%arg0: i32, %arg1: i32) -> (i32, i32) {
    %c0_i32 = arith.constant 0 : i32
    %c0_i32_0 = arith.constant 0 : i32
    %c0_i32_1 = arith.constant 0 : i32
    return %c0_i32, %c0_i32_0 : i32, i32
  }
  func.func @transform_3(%arg0: i32, %arg1: i32) -> (i32, i32) {
    %c0_i32 = arith.constant 0 : i32
    %c0_i32_0 = arith.constant 0 : i32
    %c0_i32_1 = arith.constant 0 : i32
    return %c0_i32, %c0_i32_0 : i32, i32
  }
  func.func @transform_4(%arg0: i32, %arg1: i32) -> (i32, i32) {
    %c0_i32 = arith.constant 0 : i32
    %c0_i32_0 = arith.constant 0 : i32
    %c0_i32_1 = arith.constant 0 : i32
    return %c0_i32, %c0_i32_0 : i32, i32
  }
  func.func @transform_5(%arg0: i32, %arg1: i32) -> (i32, i32, i32) {
    %c0_i32 = arith.constant 0 : i32
    %c0_i32_0 = arith.constant 0 : i32
    return %arg0, %c0_i32, %arg1 : i32, i32, i32
  }
  func.func @transform_6(%arg0: i32, %arg1: i32) -> (i32, i32, i32) {
    %c0_i32 = arith.constant 0 : i32
    %c0_i32_0 = arith.constant 0 : i32
    return %arg0, %arg1, %c0_i32 : i32, i32, i32
  }
}

</mosaic_0001>

<bundles_post_ra>
// kernel: tpu_custom_call.1
= control target key start
LH: loop header
LB: loop body
LE: loop exit
PB: predicated region body
PF: predicated region fallthrough
CT: control target
= control target key end

     0   :  { %s3954_s0 = inlined_call_operand.hbm [shape: f32[2,256,36], index: 0, kind: input, shape index: {}]   ;;  %s3955_s1 = inlined_call_operand.hbm [shape: f32[36,64], index: 1, kind: input, shape index: {}]   ;;  %s3956_s2 = inlined_call_operand.hbm [shape: f32[1,64], index: 2, kind: input, shape index: {}]   ;;  %s3957_s3 = inlined_call_operand.hbm [shape: f32[32,32], index: 3, kind: input, shape index: {}]   ;;  %s3958_s4 = inlined_call_operand.hbm [shape: f32[1,32], index: 4, kind: input, shape index: {}]   ;;  %s3959_s5 = inlined_call_operand.hbm [shape: f32[2,32,256], index: 5, kind: output, shape index: {0}]   ;;  %s3960_s6 = inlined_call_operand.hbm [shape: f32[2,256,256], index: 6, kind: output, shape index: {1}]  }
   0x1   :  { %3976 = sst [smem:[#allocation26_spill]] %s3954_s0 }
   0x2   :  { %3977 = sst [smem:[#allocation27_spill]] %s3955_s1 }
   0x3   :  { %3978 = sst [smem:[#allocation28_spill]] %s3956_s2 }
   0x4   :  { %3979 = sst [smem:[#allocation29_spill]] %s3957_s3 }
   0x5   :  { %3980 = sst [smem:[#allocation30_spill]] %s3959_s5 }
   0x6   :  { %3981 = sst [smem:[#allocation31_spill]] %s3960_s6 }
   0x7   :  { %12 = vsyncpa [#allocation5], 0 }
   0x8   :  { %14 = vsyncpa [#allocation5 + $0x1], 0 }
   0x9   :  { %15 = vsyncpa [#allocation8], 0 }
   0xa   :  { %16 = vsyncpa [#allocation11], 0 }
   0xb   :  { %17 = vsyncpa [#allocation6], 0 }
   0xc   :  { %19 = vsyncpa [#allocation6 + $0x1], 0 }
   0xd   :  { %20 = vsyncpa [#allocation15], 0 }
   0xe   :  { %22 = vsyncpa [#allocation15 + $0x1], 0  ;;  %s3014_s21 = smov 0   ;;  %s3016_s22 = smov 0  }
   0xf   :  { %s3018_s23 = smov 0   ;;  %s3020_s24 = smov 0  }
  0x10   :  { %s3022_s25 = smov 0   ;;  %s3024_s26 = smov 0  }
  0x11   :  { %s3026_s27 = smov 0   ;;  %s3028_s28 = smov 0  }
  0x12   :  { %s3030_s29 = smov 0   ;;  %s3032_s30 = smov 0  }
  0x13   :  { %s3034_s7 = smov 0  }
  0x14 LB: > { %3982 = sst [smem:[#allocation21_spill]] %s2923_s21  ;;  %s2056_s8 = sadd.s32 4294967295, %s2963_s7   ;;  %s2963_s7 = sphi %s3034_s7, %s28_s7   ;;  %s2959_s30 = sphi %s3032_s30, %s4024_s30   ;;  %s2955_s29 = sphi %s3030_s29, %s4023_s29   ;;  %s2951_s28 = sphi %s3028_s28, %s4022_s28   ;;  %s2947_s27 = sphi %s3026_s27, %s4021_s27   ;;  %s2943_s26 = sphi %s3024_s26, %s4020_s26   ;;  %s2939_s25 = sphi %s3022_s25, %s4019_s25   ;;  %s2935_s24 = sphi %s3020_s24, %s4018_s24   ;;  %s2931_s23 = sphi %s3018_s23, %s4017_s23   ;;  %s2927_s22 = sphi %s3016_s22, %s4016_s22   ;;  %s2923_s21 = sphi %s3014_s21, %s4015_s21  }
  0x15   : > { %3983 = sst [smem:[#allocation22_spill]] %s2947_s27  ;;  %s2057_s9 = sadd.s32 4294967294, %s2963_s7  }
  0x16   : > { %3984 = sst [smem:[#allocation23_spill]] %s2951_s28  ;;  %p60_p0 = scmp.ne.s32.totalorder %s2939_s25, %s2935_s24 }
  0x17   : > { %p3070_p1 = scmp.eq.s32.totalorder %s2056_s8, 0  ;;  %p169_p2 = scmp.ne.s32.totalorder %s2931_s23, %s2927_s22 }
  0x18   : > { %p170_p3 = scmp.eq.s32.totalorder %s2056_s8, 3  ;;  %p175_p5 = scmp.ne.s32.totalorder %s2927_s22, %s2923_s21 }
  0x19   : > { %s3985_s10 = scalar_select %p3070_p1, 1, 0 }
  0x1a   : > { %p3078_p4 = por %p3070_p1, %p60_p0  ;;  %p3084_p6 = por %p170_p3, %p169_p2 }
  0x1b   : > { %p176_p7 = scmp.eq.s32.totalorder %s2057_s9, 3  ;;  %p2058_p8 = scmp.ge.s32.totalorder %s2963_s7, 1 }
  0x1c   : > { %s3986_s11 = scalar_select %p3078_p4, 1, 0 }
  0x1d   : > { %s3987_s12 = scalar_select %p3084_p6, 1, 0 }
  0x1e   : > { %p211_p9 = scmp.lt.s32.totalorder %s2963_s7, 5  ;;  %p3090_p10 = por %p176_p7, %p175_p5 }
  0x1f   : > { %3988 = sst [smem:[#allocation24_spill]] %s3987_s12  ;;  %s2965_s15 = smov [#allocation7]  }
  0x20   : > { %s3989_s13 = scalar_select %p3090_p10, 1, 0 }
  0x21   : > { %p3094_p11 = pnand %p2058_p8, %p211_p9  ;;  %s223_s16 = sshll.u32 %s2965_s15, 4  ;;  %s224_s16 = int_to_ptr.vmem [resolvable:$true] %s223_s16 }
  0x22   : > { %3990 = sst [smem:[#allocation25_spill]] %s3989_s13  ;;  %s2966_s18 = smov [#allocation10]  }
  0x23   : > { %s3991_s14 = scalar_select %p3094_p11, 1, 0 }
  0x24   : > { %p2430_p12 = pneg %p3094_p11  ;;  %s247_s19 = sshll.u32 %s2966_s18, 4  ;;  %s3106_s19 = int_to_ptr.vmem [resolvable:$true] %s247_s19 }
  0x25   : > { %s3993_s1 = sld [smem:[#allocation27_spill]] }
  0x26   : > { %p3102_p13 = pnand %p2430_p12, %p3070_p1 }
  0x28   : > { %p3116_p2 = pneg %p3102_p13 }
  0x2b   : > { %s2659_s8 = scalar_lea.hbm %s3993_s1, 640 }
  0x2c   : > { %p2660_p0 = scmp.ne.s32.totalorder %s3993_s1, %s2659_s8  ;;  %p2666_p7 = scmp.lt.u32.totalorder %s2659_s8, %s3993_s1 }
  0x2e   : > { %p2662_p3 = pnand %p3116_p2, %p2660_p0 }
  0x30   : > { %p2663_p5 = pneg %p2662_p3 }
  0x32   : > { %p2668_p8 = pnand %p2666_p7, %p2663_p5 }
  0x34   : > { %2671 = shalt.err (!%p2668_p8)
}
  0x35   : > { %s2672_s20 = scalar_lea.vmem %s224_s16, 640  ;;  %p2680_p6 = scmp.lt.s32.totalorder %s224_s16, %s224_s16 }
  0x36   : > { %p2673_p9 = scmp.ne.s32.totalorder %s224_s16, %s2672_s20  ;;  %p2681_p1 = scmp.lt.s32.totalorder %s2672_s20, %s2672_s20 }
  0x38   : > { %p2675_p12 = pnand %p2673_p9, %p3116_p2  ;;  %p2682_p4 = por %p2681_p1, %p2680_p6 }
  0x3a   : > { %p2676_p10 = pneg %p2675_p12 }
  0x3c   : > { %p2683_p11 = pnand %p2682_p4, %p2676_p10 }
  0x3e   : > { %2686 = shalt.err (!%p2683_p11)
}
  0x3f   : > { %s3974_s13 = smov 128   ;;  %s3975_s24 = smov 8  }
  0x40   : > { %2433 = dma.hbm_to_vmem [thread:$0]  (!%p3102_p13), %s3993_s1, 640, %s224_s16, [#allocation8], %s3974_s13, %s3974_s13, %s3975_s24  }
  0x41   : > { %s3995_s3 = sld [smem:[#allocation29_spill]] }
  0x47   : > { %s2687_s5 = scalar_lea.hbm %s3995_s3, 512 }
  0x48   : > { %p2688_p1 = scmp.ne.s32.totalorder %s3995_s3, %s2687_s5  ;;  %p2694_p10 = scmp.lt.u32.totalorder %s2687_s5, %s3995_s3 }
  0x4a   : > { %p2690_p4 = pnand %p2688_p1, %p3116_p2 }
  0x4c   : > { %p2691_p6 = pneg %p2690_p4 }
  0x4e   : > { %p2696_p11 = pnand %p2694_p10, %p2691_p6 }
  0x50   : > { %2699 = shalt.err (!%p2696_p11)
}
  0x51   : > { %s2700_s16 = scalar_lea.vmem %s3106_s19, 512  ;;  %p2708_p7 = scmp.lt.s32.totalorder %s3106_s19, %s3106_s19 }
  0x52   : > { %p2701_p0 = scmp.ne.s32.totalorder %s3106_s19, %s2700_s16  ;;  %p2709_p8 = scmp.lt.s32.totalorder %s2700_s16, %s2700_s16 }
  0x54   : > { %p2703_p3 = pnand %p2701_p0, %p3116_p2  ;;  %p2710_p9 = por %p2709_p8, %p2708_p7 }
  0x56   : > { %p2704_p5 = pneg %p2703_p3 }
  0x58   : > { %p2711_p12 = pnand %p2710_p9, %p2704_p5 }
  0x5a   : > { %2714 = shalt.err (!%p2711_p12)
}
  0x5b   : > { %2439 = dma.hbm_to_vmem [thread:$0]  (!%p3102_p13), %s3995_s3, 512, %s3106_s19, [#allocation11], %s3974_s13, %s3974_s13, %s3975_s24  }
  0x5c   : > { %s2969_s28 = smov [#allocation9]   ;;  %s2970_s21 = smov [#allocation12]  }
  0x5d   : > { %s237_s12 = sshll.u32 %s2969_s28, 4  ;;  %s261_s8 = sshll.u32 %s2970_s21, 4  ;;  %s238_s12 = int_to_ptr.vmem [resolvable:$true] %s237_s12  ;;  %s262_s8 = int_to_ptr.vmem [resolvable:$true] %s261_s8 }
  0x5e   : > { %s3996_s2 = sld [smem:[#allocation28_spill]] }
  0x64   : > { %s2715_s20 = scalar_lea.hbm %s3996_s2, 16 }
  0x65   : > { %p2716_p1 = scmp.ne.s32.totalorder %s3996_s2, %s2715_s20  ;;  %p2722_p10 = scmp.lt.u32.totalorder %s2715_s20, %s3996_s2 }
  0x67   : > { %p2718_p4 = pnand %p2716_p1, %p3116_p2 }
  0x69   : > { %p2719_p6 = pneg %p2718_p4 }
  0x6b   : > { %p2724_p11 = pnand %p2722_p10, %p2719_p6 }
  0x6d   : > { %2727 = shalt.err (!%p2724_p11)
}
  0x6e   : > { %s2728_s19 = scalar_lea.vmem %s238_s12, 16  ;;  %s2735_s6 = scalar_lea.vmem %s238_s12, 32 }
  0x6f   : > { %p2729_p0 = scmp.ne.s32.totalorder %s238_s12, %s2728_s19  ;;  %p2736_p7 = scmp.lt.s32.totalorder %s238_s12, %s238_s12 }
  0x70   : > { %p2737_p8 = scmp.lt.s32.totalorder %s2735_s6, %s2728_s19 }
  0x71   : > { %p2731_p3 = pnand %p2729_p0, %p3116_p2 }
  0x72   : > { %p2738_p9 = por %p2737_p8, %p2736_p7 }
  0x73   : > { %p2732_p5 = pneg %p2731_p3 }
  0x75   : > { %p2739_p12 = pnand %p2738_p9, %p2732_p5 }
  0x77   : > { %2742 = shalt.err (!%p2739_p12)
}
  0x78   : > { %2436 = dma.hbm_to_vmem [thread:$0]  (!%p3102_p13), %s3996_s2, 16, %s238_s12, [#allocation8]  }
  0x79   : > { %s2743_s9 = scalar_lea.hbm %s3958_s4, 16 }
  0x7a   : > { %p2744_p1 = scmp.ne.s32.totalorder %s3958_s4, %s2743_s9  ;;  %p2750_p10 = scmp.lt.u32.totalorder %s2743_s9, %s3958_s4 }
  0x7c   : > { %p2746_p4 = pnand %p2744_p1, %p3116_p2 }
  0x7e   : > { %p2747_p6 = pneg %p2746_p4 }
  0x80   : > { %p2752_p11 = pnand %p2750_p10, %p2747_p6 }
  0x82   : > { %2755 = shalt.err (!%p2752_p11)
}
  0x83   : > { %s2756_s19 = scalar_lea.vmem %s262_s8, 16  ;;  %s2763_s12 = scalar_lea.vmem %s262_s8, 32 }
  0x84   : > { %p2757_p0 = scmp.ne.s32.totalorder %s262_s8, %s2756_s19  ;;  %p2764_p7 = scmp.lt.s32.totalorder %s262_s8, %s262_s8 }
  0x85   : > { %p2765_p8 = scmp.lt.s32.totalorder %s2763_s12, %s2756_s19 }
  0x86   : > { %p2759_p3 = pnand %p2757_p0, %p3116_p2 }
  0x87   : > { %p2766_p9 = por %p2765_p8, %p2764_p7 }
  0x88   : > { %p2760_p5 = pneg %p2759_p3 }
  0x8a   : > { %p2767_p12 = pnand %p2766_p9, %p2760_p5 }
  0x8c   : > { %2770 = shalt.err (!%p2767_p12)
}
  0x8d   : > { %2442 = dma.hbm_to_vmem [thread:$0]  (!%p3102_p13), %s3958_s4, 16, %s262_s8, [#allocation11]  }
  0x8e   : > { %s37_s15 = sadd.s32 1, %s2955_s29  ;;  %s40_s17 = sadd.s32 1, %s2959_s30 }
  0x8f   : > { %p38_p2 = scmp.ge.s32.totalorder %s37_s15, 2  ;;  %s47_s28 = sadd.s32 1, %s2943_s26 }
  0x90   : > { %p54_p1 = scmp.ne.s32.totalorder %s2943_s26, %s2939_s25  ;;  %p55_p4 = scmp.eq.s32.totalorder %s2963_s7, 0 }
  0x91   : > { %s4026_s15 = smov (%p38_p2, %s37_s15), 0  ;;  %s4028_s17 = smov (!%p38_p2, %s40_s17), %s2959_s30 }
  0x92   : > { %s155_s27 = ssub.s32 %s2955_s29, %s4026_s15  ;;  %p42_p6 = scmp.ge.s32.totalorder %s4028_s17, 2 }
  0x93   : > { %s159_s21 = sadd.s32 1, %s2931_s23  ;;  %p3209_p10 = por %p55_p4, %p54_p1 }
  0x94   : > { %p2458_p13 = scmp.lt.s32.totalorder %s2963_s7, 4  ;;  %s4030_s17 = smov (%p42_p6, %s4028_s17), 0 }
  0x95   : > { %s272_s9 = sand.u32 1, %s2943_s26   ;;  %s2163_s18 = sshll.u32 %s2959_s30, 12 }
  0x96   : > { %s44_s20 = ssub.s32 %s2959_s30, %s4030_s17  ;;  %s2064_s5 = sshll.u32 %s272_s9, 8 }
  0x97   : > { %p45_p11 = scmp.eq.s32.totalorder %s44_s20, 0  ;;  %s156_s16 = sor.u32 %s155_s27, %s44_s20 }
  0x98   : > { %p157_p0 = scmp.eq.s32.totalorder %s156_s16, 0  ;;  %s3998_s0 = sld [smem:[#allocation26_spill]] }
  0x99   : > { %s3221_s19 = scalar_select %p45_p11, %s2943_s26, %s47_s28  }
  0x9a   : > { %s3224_s12 = scalar_select %p157_p0, %s2931_s23, %s159_s21  }
  0x9b   : > { %s276_s24 = scalar_lea.vmem [#allocation4], %s2064_s5  ;;  %p3235_p3 = pnand %p2458_p13, %p3209_p10 }
  0x9c   : > { %s283_s2 = sshll.u32 %s276_s24, 4  ;;  %s3241_s28 = scalar_lea.sflag [#allocation5], %s272_s9  ;;  %s3239_s2 = int_to_ptr.vmem [resolvable:$true] %s283_s2 }
  0x9d   : > { %p2773_p7 = pneg %p3235_p3 }
  0x9e   : > { %s3229_s13 = scalar_lea.hbm %s3998_s0, %s2163_s18  ;;  %s2776_s18 = scalar_lea.hbm %s3998_s0, 8192 }
  0x9f   : > { %s2771_s21 = scalar_lea.hbm %s3229_s13, 4096  ;;  %p2777_p12 = scmp.lt.u32.totalorder %s3229_s13, %s3998_s0 }
  0xa0   : > { %p2772_p5 = scmp.ne.s32.totalorder %s3229_s13, %s2771_s21  ;;  %p2778_p2 = scmp.lt.u32.totalorder %s2776_s18, %s2771_s21 }
  0xa1   : > { %p2780_p4 = scmp.lt.u32.totalorder %s2771_s21, %s3229_s13 }
  0xa2   : > { %p2774_p8 = pnand %p2773_p7, %p2772_p5  ;;  %p2779_p1 = por %p2778_p2, %p2777_p12 }
  0xa4   : > { %p2775_p9 = pneg %p2774_p8  ;;  %p2781_p6 = por %p2780_p4, %p2779_p1 }
  0xa6   : > { %p2782_p10 = pnand %p2781_p6, %p2775_p9 }
  0xa8   : > { %2785 = shalt.err (!%p2782_p10)
}
  0xa9   : > { %s2786_s9 = scalar_lea.vmem %s3239_s2, 4096  ;;  %s2971_s5 = smov [#allocation4]  }
  0xaa   : > { %p2787_p13 = scmp.ne.s32.totalorder %s3239_s2, %s2786_s9  ;;  %s2791_s6 = sshll.u32 %s2971_s5, 4  ;;  %s2792_s6 = int_to_ptr.vmem [resolvable:$false] %s2791_s6 }
  0xab   : > { %s2793_s1 = scalar_lea.vmem %s2792_s6, 8192  ;;  %p2794_p5 = scmp.lt.s32.totalorder %s3239_s2, %s2792_s6 }
  0xac   : > { %p2789_p11 = pnand %p2787_p13, %p2773_p7  ;;  %p2795_p8 = scmp.lt.s32.totalorder %s2793_s1, %s2786_s9 }
  0xae   : > { %p2790_p0 = pneg %p2789_p11  ;;  %p2796_p12 = por %p2795_p8, %p2794_p5 }
  0xb0   : > { %p2797_p2 = pnand %p2796_p12, %p2790_p0 }
  0xb2   : > { %2800 = shalt.err (!%p2797_p2)
}
  0xb3   : > { %s4000_s21 = smov 8   ;;  %s4001_s24 = smov 128  }
  0xb4   : > { %2446 = dma.hbm_to_vmem [thread:$0]  (!%p3235_p3), %s3229_s13, 4096, %s3239_s2, %s3241_s28, %s4001_s24, %s4001_s24, %s4000_s21  }
  0xb5   : > { %p4002_p7 = scmp.ne.s32.totalorder %s3991_s14, 0 }
  0xb6   : > { %s297_s8 = sand.u32 (!%p4002_p7), 1, %s2939_s25   ;;  %p4003_p9 = scmp.ne.s32.totalorder (!%p4002_p7), %s3986_s11, 0 }
  0xb7   : > { %295 = sbr.rel (%p4002_p7) target bundleno = 1617 (0x651), region = 40  ;;  %s2068_s18 = sshll.u32 (!%p4002_p7), %s297_s8, 8 }
  0xb8   : > { %s298_s20 = scalar_lea.sflag (!%p4002_p7), [#allocation5], %s297_s8  ;;  %s3275_s16 = scalar_lea.vmem (!%p4002_p7), [#allocation4], %s2068_s18 }
  0xbe   : > { %2902 = dma.done.wait (%p4003_p9), %s298_s20, 4096  }
  0xbf   : > { %2904 = vsyncadd (%p4003_p9), %s298_s20, 4294963200  ;;  %p4004_p1 = scmp.ne.s32.totalorder %s3985_s10, 0 }
  0xc1   : > { %2906 = dma.done.wait (%p4004_p1), [#allocation8], 656  }
  0xc2   : > { %2908 = vsyncadd (%p4004_p1), [#allocation8], 4294966640 }
  0xc3   : > { %2910 = dma.done.wait (%p4004_p1), [#allocation11], 528  }
  0xc4   : > { %2912 = vsyncadd (%p4004_p1), [#allocation11], 4294966768  ;;  %s3290_s2 = sand.u32 1, %s2927_s22   ;;  %s4005_s28 = sld [smem:[#allocation22_spill]] }
  0xc5   : > { %s2073_s14 = sshll.u32 %s3290_s2, 5  ;;  %s2074_s11 = sshll.u32 %s3290_s2, 8 }
  0xc6   : > { %s3294_s13 = scalar_lea.vmem [#allocation13], %s2073_s14  ;;  %s3296_s27 = scalar_lea.vmem [#allocation14], %s2074_s11 }
  0xca   : > { %p2075_p3 = scmp.ne.s32.totalorder %s4005_s28, 0 }
  0xcb   : > { %v389_v0 = vld [vmem:[#allocation7] sm:$0xff] (!%p2075_p3)  ;;  %v390_v1 = vld [vmem:[#allocation7 + $0x8] sm:$0xff] (!%p2075_p3)  ;;  %v391_v2 = vld [vmem:[#allocation7 + $0x10] sm:$0xff] (!%p2075_p3)  ;;  %vm401_vm0 = vcmask (!%p2075_p3), 293888   ;;  %vm498_vm1 = vcmask (!%p2075_p3), 1043456   ;;  %vm770_vm2 = vcmask (!%p2075_p3), 261120  }
  0xcc   : > { %356 = sbr.rel (%p2075_p3) target bundleno = 714 (0x2ca), region = 64  ;;  %v2384_v3 = vpack.c.bf16 (!%p2075_p3), %v390_v1, %v389_v0  ;;  %v392_v4 = vld [vmem:[#allocation7 + $0x18] sm:$0xff] (!%p2075_p3)  ;;  %v357_v5 = vld [vmem:[%s3275_s16] sm:$0xff] (!%p2075_p3)  ;;  %v358_v8 = vld [vmem:[%s3275_s16 + $0x8] sm:$0xff] (!%p2075_p3)  ;;  %s2972_s10 = smov (!%p2075_p3), 96  }
  0xcd   : > { %v2388_v6 = vpack.c.bf16 (!%p2075_p3), %v392_v4, %v391_v2  ;;  %2280 = vmatprep.mubr.msk.f32.mxu0 (!%p2075_p3), %vm401_vm0, %v357_v5  ;;  %v393_v7 = vld [vmem:[#allocation7 + $0x20] sm:$0xf] (!%p2075_p3)  ;;  %v359_v9 = vld [vmem:[%s3275_s16 + $0x10] sm:$0xff] (!%p2075_p3)  ;;  %v360_v13 = vld [vmem:[%s3275_s16 + $0x18] sm:$0xff] (!%p2075_p3) }
  0xce   : > { %2385 = vmatprep.subr.bf16.mxu0 (!%p2075_p3), %v2384_v3  ;;  %v759_v10 = vld [vmem:[#allocation10] sm:$0xff] (!%p2075_p3)  ;;  %v760_v11 = vld [vmem:[#allocation10 + $0x8] sm:$0xff] (!%p2075_p3)  ;;  %v361_v14 = vld [vmem:[%s3275_s16 + $0x20] sm:$0xff] (!%p2075_p3) }
  0xcf   : > { %2387 = vmatpush3.bf16.msra.mxu0 (!%p2075_p3), %v2384_v3  ;;  %v2392_v12 = vpack.c.bf16 (!%p2075_p3), %v760_v11, %v759_v10  ;;  %v362_v15 = vld [vmem:[%s3275_s16 + $0x28] sm:$0xff] (!%p2075_p3)  ;;  %v363_v16 = vld [vmem:[%s3275_s16 + $0x30] sm:$0xff] (!%p2075_p3)  ;;  %v364_v17 = vld [vmem:[%s3275_s16 + $0x38] sm:$0xff] (!%p2075_p3) }
  0xd0   : > { %2389 = vmatprep.subr.bf16.mxu0 (!%p2075_p3), %v2388_v6  ;;  %v365_v18 = vld [vmem:[%s3275_s16 + $0x40] sm:$0xff] (!%p2075_p3)  ;;  %v366_v19 = vld [vmem:[%s3275_s16 + $0x48] sm:$0xff] (!%p2075_p3)  ;;  %v367_v20 = vld [vmem:[%s3275_s16 + $0x50] sm:$0xff] (!%p2075_p3) }
  0xd1   : > { %2393 = vmatprep.subr.bf16.mxu1 (!%p2075_p3), %v2392_v12  ;;  %v368_v21 = vld [vmem:[%s3275_s16 + $0x58] sm:$0xff] (!%p2075_p3)  ;;  %v369_v22 = vld [vmem:[%s3275_s16 + $0x60] sm:$0xff] (!%p2075_p3)  ;;  %v370_v23 = vld [vmem:[%s3275_s16 + $0x68] sm:$0xff] (!%p2075_p3) }
  0xd2   : > { %2395 = vmatpush3.bf16.msra.mxu1 (!%p2075_p3), %v2392_v12  ;;  %v371_v24 = vld [vmem:[%s3275_s16 + $0x70] sm:$0xff] (!%p2075_p3)  ;;  %v372_v25 = vld [vmem:[%s3275_s16 + $0x78] sm:$0xff] (!%p2075_p3)  ;;  %v373_v26 = vld [vmem:[%s3275_s16 + $0x80] sm:$0xff] (!%p2075_p3) }
  0xd3   : > { %2391 = vmatpush3.bf16.msra.mxu0 %v2388_v6  ;;  %v374_v27 = vld [vmem:[%s3275_s16 + $0x88] sm:$0xff]  ;;  %v375_v28 = vld [vmem:[%s3275_s16 + $0x90] sm:$0xff]  ;;  %v376_v29 = vld [vmem:[%s3275_s16 + $0x98] sm:$0xff] }
  0xd4   : > { %2278 = vmatprep.subr.msk.mxu0 %vm498_vm1, %v393_v7  ;;  %v377_v30 = vld [vmem:[%s3275_s16 + $0xa0] sm:$0xff]  ;;  %v378_v31 = vld [vmem:[%s3275_s16 + $0xa8] sm:$0xff]  ;;  %v379_v32 = vld [vmem:[%s3275_s16 + $0xb0] sm:$0xff] }
  0xd5   : > { %v380_v33 = vld [vmem:[%s3275_s16 + $0xb8] sm:$0xff]  ;;  %v381_v34 = vld [vmem:[%s3275_s16 + $0xc0] sm:$0xff]  ;;  %v382_v35 = vld [vmem:[%s3275_s16 + $0xc8] sm:$0xff] }
  0xd6   : > { %v383_v36 = vld [vmem:[%s3275_s16 + $0xd0] sm:$0xff]  ;;  %v384_v37 = vld [vmem:[%s3275_s16 + $0xd8] sm:$0xff]  ;;  %v385_v38 = vld [vmem:[%s3275_s16 + $0xe0] sm:$0xff] }
  0xd7   : > { %2279 = vmatpush3.msk.msra.mxu0 %vm498_vm1, %v393_v7  ;;  %v386_v39 = vld [vmem:[%s3275_s16 + $0xe8] sm:$0xff]  ;;  %v387_v40 = vld [vmem:[%s3275_s16 + $0xf0] sm:$0xff]  ;;  %v388_v41 = vld [vmem:[%s3275_s16 + $0xf8] sm:$0xff] }
  0xd8   : > { %2281 = vmatmul.mubr.msk.f32.vlgmr.msra.gmra.mrb[0].mxu0 %vm401_vm0, %v358_v8  ;;  %v761_v42 = vld [vmem:[#allocation10 + $0x10] sm:$0xff]  ;;  %v762_v43 = vld [vmem:[#allocation10 + $0x18] sm:$0xff] }
  0xd9   : > { %2283 = vmatprep.mubr.msk.f32.mxu0 %vm401_vm0, %v359_v9  ;;  %v2396_v44 = vpack.c.bf16 %v762_v43, %v761_v42  ;;  %v3363_v45 = vld [vmem:[#allocation9] ss:$0 sm:$0xff] }
  0xdb   : > { %2397 = vmatprep.subr.bf16.mxu1 %v2396_v44 }
  0xdc   : > { %2284 = vmatmul.mubr.msk.f32.gmra.mrb[2].mxu0 %vm401_vm0, %v360_v13  ;;  %2399 = vmatpush3.bf16.msra.mxu1 %v2396_v44 }
  0xdd   : > { %2286 = vmatprep.mubr.msk.f32.mxu0 %vm401_vm0, %v361_v14 }
  0xe0   : > { %2287 = vmatmul.mubr.msk.f32.gmra.mrb[4].mxu0 %vm401_vm0, %v362_v15 }
  0xe1   : > { %2289 = vmatprep.mubr.msk.f32.mxu0 %vm401_vm0, %v363_v16 }
  0xe4   : > { %2290 = vmatmul.mubr.msk.f32.gmra.mrb[6].mxu0 %vm401_vm0, %v364_v17 }
  0xe5   : > { %2292 = vmatprep.mubr.msk.f32.mxu0 %vm401_vm0, %v365_v18 }
  0xe8   : > { %2293 = vmatmul.mubr.msk.f32.gmra.mrb[8].mxu0 %vm401_vm0, %v366_v19 }
  0xe9   : > { %2295 = vmatprep.mubr.msk.f32.mxu0 %vm401_vm0, %v367_v20 }
  0xec   : > { %2296 = vmatmul.mubr.msk.f32.gmra.mrb[10].mxu0 %vm401_vm0, %v368_v21 }
  0xed   : > { %2298 = vmatprep.mubr.msk.f32.mxu0 %vm401_vm0, %v369_v22 }
  0xf0   : > { %2299 = vmatmul.mubr.msk.f32.gmra.mrb[12].mxu0 %vm401_vm0, %v370_v23 }
  0xf1   : > { %2301 = vmatprep.mubr.msk.f32.mxu0 %vm401_vm0, %v371_v24 }
  0xf4   : > { %2302 = vmatmul.mubr.msk.f32.gmra.mrb[14].mxu0 %vm401_vm0, %v372_v25 }
  0xf5   : > { %2304 = vmatprep.mubr.msk.f32.mxu0 %vm401_vm0, %v373_v26 }
  0xf8   : > { %2305 = vmatmul.mubr.msk.f32.gmra.mrb[16].mxu0 %vm401_vm0, %v374_v27 }
  0xf9   : > { %2307 = vmatprep.mubr.msk.f32.mxu0 %vm401_vm0, %v375_v28 }
  0xfc   : > { %2308 = vmatmul.mubr.msk.f32.gmra.mrb[18].mxu0 %vm401_vm0, %v376_v29 }
  0xfd   : > { %2310 = vmatprep.mubr.msk.f32.mxu0 %vm401_vm0, %v377_v30 }
 0x100   : > { %2311 = vmatmul.mubr.msk.f32.gmra.mrb[20].mxu0 %vm401_vm0, %v378_v31 }
 0x101   : > { %2313 = vmatprep.mubr.msk.f32.mxu0 %vm401_vm0, %v379_v32 }
 0x104   : > { %2314 = vmatmul.mubr.msk.f32.gmra.mrb[22].mxu0 %vm401_vm0, %v380_v33 }
 0x105   : > { %2316 = vmatprep.mubr.msk.f32.mxu0 %vm401_vm0, %v381_v34 }
 0x108   : > { %2317 = vmatmul.mubr.msk.f32.gmra.mrb[24].mxu0 %vm401_vm0, %v382_v35 }
 0x109   : > { %2319 = vmatprep.mubr.msk.f32.mxu0 %vm401_vm0, %v383_v36 }
 0x10c   : > { %2320 = vmatmul.mubr.msk.f32.gmra.mrb[26].mxu0 %vm401_vm0, %v384_v37 }
 0x10d   : > { %2322 = vmatprep.mubr.msk.f32.mxu0 %vm401_vm0, %v385_v38 }
 0x110   : > { %2323 = vmatmul.mubr.msk.f32.gmra.mrb[28].mxu0 %vm401_vm0, %v386_v39 }
 0x111   : > { %2325 = vmatprep.mubr.msk.f32.mxu0 %vm401_vm0, %v387_v40 }
 0x114   : > { %2326 = vmatmul.mubr.msk.f32.gmra.mrb[30].mxu0 %vm401_vm0, %v388_v41 }
 0x1ab   : > { %v2282_v46 = vpop.f32.mrb[0].mxu0 }
 0x1ac   : > { %v574_v47 = vadd.f32 %v2282_v46, %v3363_v45  ;;  %v568_v48 = vpop.f32.mrb[1].mxu0 }
 0x1ad   : > { %v569_v49 = vadd.f32 %v3363_v45, %v568_v48 }
 0x1ae   : > { %v728_v50 = vmax.f32 %v574_v47, 0.0 }
 0x1af   : > { %v727_v51 = vmax.f32 %v569_v49, 0.0  ;;  %v2285_v52 = vpop.f32.mrb[2].mxu0 }
 0x1b0   : > { %v584_v53 = vadd.f32 %v2285_v52, %v3363_v45  ;;  %v578_v54 = vpop.f32.mrb[3].mxu0 }
 0x1b1   : > { %v579_v55 = vadd.f32 %v3363_v45, %v578_v54  ;;  %2336 = vmatprep.mubr.msk.f32.mxu1 %vm770_vm2, %v727_v51  ;;  %v1124_v56 = vpack.c.bf16 %v728_v50, %v727_v51 }
 0x1b2   : > { %v730_v57 = vmax.f32 %v584_v53, 0.0  ;;  %2337 = vmatmul.mubr.msk.f32.vlgmr.msra.gmra.mrb[0].mxu1 %vm770_vm2, %v728_v50 }
 0x1b3   : > { %v729_v58 = vmax.f32 %v579_v55, 0.0  ;;  %v2288_v59 = vpop.f32.mrb[4].mxu0  ;;  %1156 = vrot.lane.b32.xlu0 %v1124_v56, %s2972_s10 }
 0x1b4   : > { %v594_v60 = vadd.f32 %v2288_v59, %v3363_v45  ;;  %v588_v61 = vpop.f32.mrb[5].mxu0 }
 0x1b5   : > { %v1125_v62 = vpack.c.bf16 %v730_v57, %v729_v58  ;;  %v589_v63 = vadd.f32 %v3363_v45, %v588_v61  ;;  %2339 = vmatprep.mubr.msk.f32.mxu1 %vm770_vm2, %v729_v58 }
 0x1b6   : > { %v732_v0 = vmax.f32 %v594_v60, 0.0  ;;  %2340 = vmatmul.mubr.msk.f32.gmra.mrb[2].mxu1 %vm770_vm2, %v730_v57 }
 0x1b7   : > { %v731_v1 = vmax.f32 %v589_v63, 0.0  ;;  %v2291_v2 = vpop.f32.mrb[6].mxu0  ;;  %1158 = vrot.lane.b32.xlu0 %v1125_v62, %s2972_s10 }
 0x1b8   : > { %v604_v3 = vadd.f32 %v2291_v2, %v3363_v45  ;;  %v598_v4 = vpop.f32.mrb[7].mxu0 }
 0x1b9   : > { %v599_v5 = vadd.f32 %v3363_v45, %v598_v4  ;;  %2342 = vmatprep.mubr.msk.f32.mxu1 %vm770_vm2, %v731_v1  ;;  %v1126_v6 = vpack.c.bf16 %v732_v0, %v731_v1 }
 0x1ba   : > { %v734_v7 = vmax.f32 %v604_v3, 0.0  ;;  %2343 = vmatmul.mubr.msk.f32.gmra.mrb[4].mxu1 %vm770_vm2, %v732_v0 }
 0x1bb   : > { %v733_v8 = vmax.f32 %v599_v5, 0.0  ;;  %v2294_v9 = vpop.f32.mrb[8].mxu0  ;;  %1160 = vrot.lane.b32.xlu1 %v1126_v6, %s2972_s10 }
 0x1bc   : > { %v614_v10 = vadd.f32 %v2294_v9, %v3363_v45  ;;  %v608_v11 = vpop.f32.mrb[9].mxu0 }
 0x1bd   : > { %v1127_v12 = vpack.c.bf16 %v734_v7, %v733_v8  ;;  %v609_v13 = vadd.f32 %v3363_v45, %v608_v11  ;;  %2345 = vmatprep.mubr.msk.f32.mxu1 %vm770_vm2, %v733_v8 }
 0x1be   : > { %v736_v14 = vmax.f32 %v614_v10, 0.0  ;;  %2346 = vmatmul.mubr.msk.f32.gmra.mrb[6].mxu1 %vm770_vm2, %v734_v7 }
 0x1bf   : > { %v735_v15 = vmax.f32 %v609_v13, 0.0  ;;  %v2297_v16 = vpop.f32.mrb[10].mxu0  ;;  %1162 = vrot.lane.b32.xlu1 %v1127_v12, %s2972_s10 }
 0x1c0   : > { %v624_v17 = vadd.f32 %v2297_v16, %v3363_v45  ;;  %v618_v18 = vpop.f32.mrb[11].mxu0 }
 0x1c1   : > { %v1128_v19 = vpack.c.bf16 %v736_v14, %v735_v15  ;;  %v619_v20 = vadd.f32 %v3363_v45, %v618_v18  ;;  %2348 = vmatprep.mubr.msk.f32.mxu1 %vm770_vm2, %v735_v15 }
 0x1c2   : > { %v738_v21 = vmax.f32 %v624_v17, 0.0  ;;  %2349 = vmatmul.mubr.msk.f32.gmra.mrb[8].mxu1 %vm770_vm2, %v736_v14 }
 0x1c3   : > { %v737_v22 = vmax.f32 %v619_v20, 0.0  ;;  %v2300_v23 = vpop.f32.mrb[12].mxu0  ;;  %1164 = vrot.lane.b32.xlu0 %v1128_v19, %s2972_s10 }
 0x1c4   : > { %v634_v24 = vadd.f32 %v2300_v23, %v3363_v45  ;;  %v628_v25 = vpop.f32.mrb[13].mxu0 }
 0x1c5   : > { %v1129_v26 = vpack.c.bf16 %v738_v21, %v737_v22  ;;  %v629_v27 = vadd.f32 %v3363_v45, %v628_v25  ;;  %2351 = vmatprep.mubr.msk.f32.mxu1 %vm770_vm2, %v737_v22 }
 0x1c6   : > { %v740_v28 = vmax.f32 %v634_v24, 0.0  ;;  %2352 = vmatmul.mubr.msk.f32.gmra.mrb[10].mxu1 %vm770_vm2, %v738_v21 }
 0x1c7   : > { %v739_v29 = vmax.f32 %v629_v27, 0.0  ;;  %v2303_v30 = vpop.f32.mrb[14].mxu0  ;;  %1166 = vrot.lane.b32.xlu1 %v1129_v26, %s2972_s10 }
 0x1c8   : > { %v644_v31 = vadd.f32 %v2303_v30, %v3363_v45  ;;  %v638_v32 = vpop.f32.mrb[15].mxu0 }
 0x1c9   : > { %v1130_v33 = vpack.c.bf16 %v740_v28, %v739_v29  ;;  %v639_v34 = vadd.f32 %v3363_v45, %v638_v32  ;;  %2354 = vmatprep.mubr.msk.f32.mxu1 %vm770_vm2, %v739_v29 }
 0x1ca   : > { %v742_v35 = vmax.f32 %v644_v31, 0.0  ;;  %2355 = vmatmul.mubr.msk.f32.gmra.mrb[12].mxu1 %vm770_vm2, %v740_v28 }
 0x1cb   : > { %v741_v36 = vmax.f32 %v639_v34, 0.0  ;;  %v2306_v37 = vpop.f32.mrb[16].mxu0  ;;  %1168 = vrot.lane.b32.xlu0 %v1130_v33, %s2972_s10 }
 0x1cc   : > { %v654_v38 = vadd.f32 %v2306_v37, %v3363_v45  ;;  %v648_v39 = vpop.f32.mrb[17].mxu0 }
 0x1cd   : > { %v1131_v40 = vpack.c.bf16 %v742_v35, %v741_v36  ;;  %v649_v41 = vadd.f32 %v3363_v45, %v648_v39  ;;  %2357 = vmatprep.mubr.msk.f32.mxu1 %vm770_vm2, %v741_v36 }
 0x1ce   : > { %v744_v42 = vmax.f32 %v654_v38, 0.0  ;;  %2358 = vmatmul.mubr.msk.f32.gmra.mrb[14].mxu1 %vm770_vm2, %v742_v35 }
 0x1cf   : > { %v743_v43 = vmax.f32 %v649_v41, 0.0  ;;  %v2309_v44 = vpop.f32.mrb[18].mxu0  ;;  %1170 = vrot.lane.b32.xlu1 %v1131_v40, %s2972_s10 }
 0x1d0   : > { %v664_v46 = vadd.f32 %v2309_v44, %v3363_v45  ;;  %v658_v47 = vpop.f32.mrb[19].mxu0 }
 0x1d1   : > { %v1132_v48 = vpack.c.bf16 %v744_v42, %v743_v43  ;;  %v659_v49 = vadd.f32 %v3363_v45, %v658_v47  ;;  %2360 = vmatprep.mubr.msk.f32.mxu1 %vm770_vm2, %v743_v43  ;;  %v3461_v47 = vld [vmem:[#allocation12] ss:$0 sm:$0xff] }
 0x1d2   : > { %v746_v50 = vmax.f32 %v664_v46, 0.0  ;;  %2361 = vmatmul.mubr.msk.f32.gmra.mrb[16].mxu1 %vm770_vm2, %v744_v42 }
 0x1d3   : > { %v745_v51 = vmax.f32 %v659_v49, 0.0  ;;  %v2312_v52 = vpop.f32.mrb[20].mxu0  ;;  %1172 = vrot.lane.b32.xlu0 %v1132_v48, %s2972_s10 }
 0x1d4   : > { %v674_v53 = vadd.f32 %v2312_v52, %v3363_v45  ;;  %v668_v54 = vpop.f32.mrb[21].mxu0 }
 0x1d5   : > { %v1133_v55 = vpack.c.bf16 %v746_v50, %v745_v51  ;;  %v669_v56 = vadd.f32 %v3363_v45, %v668_v54  ;;  %2363 = vmatprep.mubr.msk.f32.mxu1 %vm770_vm2, %v745_v51 }
 0x1d6   : > { %v748_v57 = vmax.f32 %v674_v53, 0.0  ;;  %2364 = vmatmul.mubr.msk.f32.gmra.mrb[18].mxu1 %vm770_vm2, %v746_v50 }
 0x1d7   : > { %v747_v58 = vmax.f32 %v669_v56, 0.0  ;;  %v2315_v59 = vpop.f32.mrb[22].mxu0  ;;  %1174 = vrot.lane.b32.xlu1 %v1133_v55, %s2972_s10 }
 0x1d8   : > { %v684_v60 = vadd.f32 %v2315_v59, %v3363_v45  ;;  %v678_v61 = vpop.f32.mrb[23].mxu0 }
 0x1d9   : > { %v1134_v62 = vpack.c.bf16 %v748_v57, %v747_v58  ;;  %v679_v63 = vadd.f32 %v3363_v45, %v678_v61  ;;  %2366 = vmatprep.mubr.msk.f32.mxu1 %vm770_vm2, %v747_v58 }
 0x1da   : > { %v750_v0 = vmax.f32 %v684_v60, 0.0  ;;  %2367 = vmatmul.mubr.msk.f32.gmra.mrb[20].mxu1 %vm770_vm2, %v748_v57 }
 0x1db   : > { %v749_v1 = vmax.f32 %v679_v63, 0.0  ;;  %v2318_v2 = vpop.f32.mrb[24].mxu0  ;;  %1176 = vrot.lane.b32.xlu0 %v1134_v62, %s2972_s10 }
 0x1dc   : > { %v694_v3 = vadd.f32 %v2318_v2, %v3363_v45  ;;  %v688_v4 = vpop.f32.mrb[25].mxu0 }
 0x1dd   : > { %v1135_v5 = vpack.c.bf16 %v750_v0, %v749_v1  ;;  %v689_v6 = vadd.f32 %v3363_v45, %v688_v4  ;;  %2369 = vmatprep.mubr.msk.f32.mxu1 %vm770_vm2, %v749_v1 }
 0x1de   : > { %v752_v7 = vmax.f32 %v694_v3, 0.0  ;;  %2370 = vmatmul.mubr.msk.f32.gmra.mrb[22].mxu1 %vm770_vm2, %v750_v0 }
 0x1df   : > { %v751_v8 = vmax.f32 %v689_v6, 0.0  ;;  %v2321_v9 = vpop.f32.mrb[26].mxu0  ;;  %1178 = vrot.lane.b32.xlu1 %v1135_v5, %s2972_s10 }
 0x1e0   : > { %v704_v10 = vadd.f32 %v2321_v9, %v3363_v45  ;;  %v698_v11 = vpop.f32.mrb[27].mxu0 }
 0x1e1   : > { %v1136_v12 = vpack.c.bf16 %v752_v7, %v751_v8  ;;  %v699_v13 = vadd.f32 %v3363_v45, %v698_v11  ;;  %2372 = vmatprep.mubr.msk.f32.mxu1 %vm770_vm2, %v751_v8 }
 0x1e2   : > { %v754_v14 = vmax.f32 %v704_v10, 0.0  ;;  %2373 = vmatmul.mubr.msk.f32.gmra.mrb[24].mxu1 %vm770_vm2, %v752_v7 }
 0x1e3   : > { %v753_v15 = vmax.f32 %v699_v13, 0.0  ;;  %v2324_v16 = vpop.f32.mrb[28].mxu0  ;;  %1180 = vrot.lane.b32.xlu0 %v1136_v12, %s2972_s10 }
 0x1e4   : > { %v714_v17 = vadd.f32 %v2324_v16, %v3363_v45  ;;  %v708_v18 = vpop.f32.mrb[29].mxu0 }
 0x1e5   : > { %v1137_v19 = vpack.c.bf16 %v754_v14, %v753_v15  ;;  %v709_v20 = vadd.f32 %v3363_v45, %v708_v18  ;;  %2375 = vmatprep.mubr.msk.f32.mxu1 %vm770_vm2, %v753_v15 }
 0x1e6   : > { %v756_v21 = vmax.f32 %v714_v17, 0.0  ;;  %2376 = vmatmul.mubr.msk.f32.gmra.mrb[26].mxu1 %vm770_vm2, %v754_v14 }
 0x1e7   : > { %v755_v22 = vmax.f32 %v709_v20, 0.0  ;;  %v2327_v23 = vpop.f32.mrb[30].mxu0  ;;  %1182 = vrot.lane.b32.xlu1 %v1137_v19, %s2972_s10 }
 0x1e8   : > { %v724_v24 = vadd.f32 %v2327_v23, %v3363_v45  ;;  %v718_v25 = vpop.f32.mrb[31].mxu0 }
 0x1e9   : > { %v1138_v26 = vpack.c.bf16 %v756_v21, %v755_v22  ;;  %v719_v27 = vadd.f32 %v3363_v45, %v718_v25  ;;  %2378 = vmatprep.mubr.msk.f32.mxu1 %vm770_vm2, %v755_v22 }
 0x1ea   : > { %v758_v28 = vmax.f32 %v724_v24, 0.0  ;;  %2379 = vmatmul.mubr.msk.f32.gmra.mrb[28].mxu1 %vm770_vm2, %v756_v21 }
 0x1eb   : > { %v757_v29 = vmax.f32 %v719_v27, 0.0  ;;  %1184 = vrot.lane.b32.xlu0 %v1138_v26, %s2972_s10 }
 0x1ed   : > { %v1139_v30 = vpack.c.bf16 %v758_v28, %v757_v29  ;;  %2381 = vmatprep.mubr.msk.f32.mxu1 %vm770_vm2, %v757_v29 }
 0x1ee   : > { %2382 = vmatmul.mubr.msk.f32.gmra.mrb[30].mxu1 %vm770_vm2, %v758_v28 }
 0x1ef   : > { %1186 = vrot.lane.b32.xlu1 %v1139_v30, %s2972_s10 }
 0x225   : > { %v1157_v31 = vpop.permute.xlu0 %1156 }
 0x226   : > { %1204 = vst.msk [vmem:[#allocation2] sm:$0xff] %vm770_vm2, %v1157_v31 }
 0x229   : > { %v1159_v32 = vpop.permute.xlu0 %1158 }
 0x22a   : > { %1205 = vst.msk [vmem:[#allocation2 + $0x8] sm:$0xff] %vm770_vm2, %v1159_v32 }
 0x22d   : > { %v1161_v45 = vpop.permute.xlu1 %1160 }
 0x22e   : > { %1206 = vst.msk [vmem:[#allocation2 + $0x10] sm:$0xff] %vm770_vm2, %v1161_v45 }
 0x231   : > { %v1163_v33 = vpop.permute.xlu1 %1162 }
 0x232   : > { %1207 = vst.msk [vmem:[#allocation2 + $0x18] sm:$0xff] %vm770_vm2, %v1163_v33 }
 0x235   : > { %v1165_v34 = vpop.permute.xlu0 %1164 }
 0x236   : > { %1208 = vst.msk [vmem:[#allocation2 + $0x20] sm:$0xff] %vm770_vm2, %v1165_v34 }
 0x239   : > { %v1167_v35 = vpop.permute.xlu1 %1166 }
 0x23a   : > { %1209 = vst.msk [vmem:[#allocation2 + $0x28] sm:$0xff] %vm770_vm2, %v1167_v35 }
 0x23d   : > { %v1169_v36 = vpop.permute.xlu0 %1168 }
 0x23e   : > { %1210 = vst.msk [vmem:[#allocation2 + $0x30] sm:$0xff] %vm770_vm2, %v1169_v36 }
 0x241   : > { %v1171_v37 = vpop.permute.xlu1 %1170 }
 0x242   : > { %1211 = vst.msk [vmem:[#allocation2 + $0x38] sm:$0xff] %vm770_vm2, %v1171_v37 }
 0x245   : > { %v1173_v38 = vpop.permute.xlu0 %1172 }
 0x246   : > { %1212 = vst.msk [vmem:[#allocation2 + $0x40] sm:$0xff] %vm770_vm2, %v1173_v38 }
 0x249   : > { %v1175_v39 = vpop.permute.xlu1 %1174 }
 0x24a   : > { %1213 = vst.msk [vmem:[#allocation2 + $0x48] sm:$0xff] %vm770_vm2, %v1175_v39 }
 0x24d   : > { %v1177_v40 = vpop.permute.xlu0 %1176 }
 0x24e   : > { %1214 = vst.msk [vmem:[#allocation2 + $0x50] sm:$0xff] %vm770_vm2, %v1177_v40 }
 0x251   : > { %v1179_v41 = vpop.permute.xlu1 %1178 }
 0x252   : > { %1215 = vst.msk [vmem:[#allocation2 + $0x58] sm:$0xff] %vm770_vm2, %v1179_v41 }
 0x255   : > { %v1181_v42 = vpop.permute.xlu0 %1180 }
 0x256   : > { %1216 = vst.msk [vmem:[#allocation2 + $0x60] sm:$0xff] %vm770_vm2, %v1181_v42 }
 0x259   : > { %v1183_v43 = vpop.permute.xlu1 %1182 }
 0x25a   : > { %1217 = vst.msk [vmem:[#allocation2 + $0x68] sm:$0xff] %vm770_vm2, %v1183_v43 }
 0x25d   : > { %v1185_v44 = vpop.permute.xlu0 %1184 }
 0x25e   : > { %1218 = vst.msk [vmem:[#allocation2 + $0x70] sm:$0xff] %vm770_vm2, %v1185_v44 }
 0x261   : > { %v1187_v46 = vpop.permute.xlu1 %1186 }
 0x262   : > { %1219 = vst.msk [vmem:[#allocation2 + $0x78] sm:$0xff] %vm770_vm2, %v1187_v46 }
 0x285   : > { %v2338_v48 = vpop.f32.mrb[0].mxu1 }
 0x286   : > { %v939_v49 = vadd.f32 %v2338_v48, %v3461_v47  ;;  %v933_v50 = vpop.f32.mrb[1].mxu1 }
 0x287   : > { %v934_v51 = vadd.f32 %v3461_v47, %v933_v50 }
 0x288   : > { %v1093_v52 = vmax.f32 %v939_v49, 0.0 }
 0x289   : > { %v1092_v53 = vmax.f32 %v934_v51, 0.0  ;;  %v2341_v54 = vpop.f32.mrb[2].mxu1 }
 0x28a   : > { %v949_v55 = vadd.f32 %v2341_v54, %v3461_v47  ;;  %v943_v56 = vpop.f32.mrb[3].mxu1 }
 0x28b   : > { %v1220_v57 = vpack.c.bf16 %v1093_v52, %v1092_v53  ;;  %v944_v58 = vadd.f32 %v3461_v47, %v943_v56 }
 0x28c   : > { %v1095_v59 = vmax.f32 %v949_v55, 0.0 }
 0x28d   : > { %1236 = vst.msk [vmem:[#allocation3] sm:$0xff] %vm770_vm2, %v1220_v57  ;;  %v1094_v60 = vmax.f32 %v944_v58, 0.0  ;;  %v2344_v61 = vpop.f32.mrb[4].mxu1 }
 0x28e   : > { %v959_v62 = vadd.f32 %v2344_v61, %v3461_v47  ;;  %v953_v63 = vpop.f32.mrb[5].mxu1 }
 0x28f   : > { %v1221_v0 = vpack.c.bf16 %v1095_v59, %v1094_v60  ;;  %v954_v1 = vadd.f32 %v3461_v47, %v953_v63 }
 0x290   : > { %v1097_v2 = vmax.f32 %v959_v62, 0.0 }
 0x291   : > { %1237 = vst.msk [vmem:[#allocation3 + $0x8] sm:$0xff] %vm770_vm2, %v1221_v0  ;;  %v1096_v3 = vmax.f32 %v954_v1, 0.0  ;;  %v2347_v4 = vpop.f32.mrb[6].mxu1 }
 0x292   : > { %v969_v5 = vadd.f32 %v2347_v4, %v3461_v47  ;;  %v963_v6 = vpop.f32.mrb[7].mxu1 }
 0x293   : > { %v1222_v7 = vpack.c.bf16 %v1097_v2, %v1096_v3  ;;  %v964_v8 = vadd.f32 %v3461_v47, %v963_v6 }
 0x294   : > { %v1099_v9 = vmax.f32 %v969_v5, 0.0 }
 0x295   : > { %1238 = vst.msk [vmem:[#allocation3 + $0x10] sm:$0xff] %vm770_vm2, %v1222_v7  ;;  %v1098_v10 = vmax.f32 %v964_v8, 0.0  ;;  %v2350_v11 = vpop.f32.mrb[8].mxu1 }
 0x296   : > { %v979_v12 = vadd.f32 %v2350_v11, %v3461_v47  ;;  %v973_v13 = vpop.f32.mrb[9].mxu1 }
 0x297   : > { %v1223_v14 = vpack.c.bf16 %v1099_v9, %v1098_v10  ;;  %v974_v15 = vadd.f32 %v3461_v47, %v973_v13 }
 0x298   : > { %v1101_v16 = vmax.f32 %v979_v12, 0.0 }
 0x299   : > { %1239 = vst.msk [vmem:[#allocation3 + $0x18] sm:$0xff] %vm770_vm2, %v1223_v14  ;;  %v1100_v17 = vmax.f32 %v974_v15, 0.0  ;;  %v2353_v18 = vpop.f32.mrb[10].mxu1 }
 0x29a   : > { %v989_v19 = vadd.f32 %v2353_v18, %v3461_v47  ;;  %v983_v20 = vpop.f32.mrb[11].mxu1 }
 0x29b   : > { %v1224_v21 = vpack.c.bf16 %v1101_v16, %v1100_v17  ;;  %v984_v22 = vadd.f32 %v3461_v47, %v983_v20 }
 0x29c   : > { %v1103_v23 = vmax.f32 %v989_v19, 0.0 }
 0x29d   : > { %1240 = vst.msk [vmem:[#allocation3 + $0x20] sm:$0xff] %vm770_vm2, %v1224_v21  ;;  %v1102_v24 = vmax.f32 %v984_v22, 0.0  ;;  %v2356_v25 = vpop.f32.mrb[12].mxu1 }
 0x29e   : > { %v999_v26 = vadd.f32 %v2356_v25, %v3461_v47  ;;  %v993_v27 = vpop.f32.mrb[13].mxu1 }
 0x29f   : > { %v1225_v28 = vpack.c.bf16 %v1103_v23, %v1102_v24  ;;  %v994_v29 = vadd.f32 %v3461_v47, %v993_v27 }
 0x2a0   : > { %v1105_v30 = vmax.f32 %v999_v26, 0.0 }
 0x2a1   : > { %1241 = vst.msk [vmem:[#allocation3 + $0x28] sm:$0xff] %vm770_vm2, %v1225_v28  ;;  %v1104_v31 = vmax.f32 %v994_v29, 0.0  ;;  %v2359_v32 = vpop.f32.mrb[14].mxu1 }
 0x2a2   : > { %v1009_v45 = vadd.f32 %v2359_v32, %v3461_v47  ;;  %v1003_v33 = vpop.f32.mrb[15].mxu1 }
 0x2a3   : > { %v1226_v34 = vpack.c.bf16 %v1105_v30, %v1104_v31  ;;  %v1004_v35 = vadd.f32 %v3461_v47, %v1003_v33 }
 0x2a4   : > { %v1107_v36 = vmax.f32 %v1009_v45, 0.0 }
 0x2a5   : > { %1242 = vst.msk [vmem:[#allocation3 + $0x30] sm:$0xff] %vm770_vm2, %v1226_v34  ;;  %v1106_v37 = vmax.f32 %v1004_v35, 0.0  ;;  %v2362_v38 = vpop.f32.mrb[16].mxu1 }
 0x2a6   : > { %v1019_v39 = vadd.f32 %v2362_v38, %v3461_v47  ;;  %v1013_v40 = vpop.f32.mrb[17].mxu1 }
 0x2a7   : > { %v1227_v41 = vpack.c.bf16 %v1107_v36, %v1106_v37  ;;  %v1014_v42 = vadd.f32 %v3461_v47, %v1013_v40 }
 0x2a8   : > { %v1109_v43 = vmax.f32 %v1019_v39, 0.0 }
 0x2a9   : > { %1243 = vst.msk [vmem:[#allocation3 + $0x38] sm:$0xff] %vm770_vm2, %v1227_v41  ;;  %v1108_v44 = vmax.f32 %v1014_v42, 0.0  ;;  %v2365_v46 = vpop.f32.mrb[18].mxu1 }
 0x2aa   : > { %v1029_v48 = vadd.f32 %v2365_v46, %v3461_v47  ;;  %v1023_v49 = vpop.f32.mrb[19].mxu1 }
 0x2ab   : > { %v1228_v50 = vpack.c.bf16 %v1109_v43, %v1108_v44  ;;  %v1024_v51 = vadd.f32 %v3461_v47, %v1023_v49 }
 0x2ac   : > { %v1111_v52 = vmax.f32 %v1029_v48, 0.0 }
 0x2ad   : > { %1244 = vst.msk [vmem:[#allocation3 + $0x40] sm:$0xff] %vm770_vm2, %v1228_v50  ;;  %v1110_v53 = vmax.f32 %v1024_v51, 0.0  ;;  %v2368_v54 = vpop.f32.mrb[20].mxu1 }
 0x2ae   : > { %v1039_v55 = vadd.f32 %v2368_v54, %v3461_v47  ;;  %v1033_v56 = vpop.f32.mrb[21].mxu1 }
 0x2af   : > { %v1229_v57 = vpack.c.bf16 %v1111_v52, %v1110_v53  ;;  %v1034_v58 = vadd.f32 %v3461_v47, %v1033_v56 }
 0x2b0   : > { %v1113_v59 = vmax.f32 %v1039_v55, 0.0 }
 0x2b1   : > { %1245 = vst.msk [vmem:[#allocation3 + $0x48] sm:$0xff] %vm770_vm2, %v1229_v57  ;;  %v1112_v60 = vmax.f32 %v1034_v58, 0.0  ;;  %v2371_v61 = vpop.f32.mrb[22].mxu1 }
 0x2b2   : > { %v1049_v62 = vadd.f32 %v2371_v61, %v3461_v47  ;;  %v1043_v63 = vpop.f32.mrb[23].mxu1 }
 0x2b3   : > { %v1230_v0 = vpack.c.bf16 %v1113_v59, %v1112_v60  ;;  %v1044_v1 = vadd.f32 %v3461_v47, %v1043_v63 }
 0x2b4   : > { %v1115_v2 = vmax.f32 %v1049_v62, 0.0 }
 0x2b5   : > { %1246 = vst.msk [vmem:[#allocation3 + $0x50] sm:$0xff] %vm770_vm2, %v1230_v0  ;;  %v1114_v3 = vmax.f32 %v1044_v1, 0.0  ;;  %v2374_v4 = vpop.f32.mrb[24].mxu1 }
 0x2b6   : > { %v1059_v5 = vadd.f32 %v2374_v4, %v3461_v47  ;;  %v1053_v6 = vpop.f32.mrb[25].mxu1 }
 0x2b7   : > { %v1231_v7 = vpack.c.bf16 %v1115_v2, %v1114_v3  ;;  %v1054_v8 = vadd.f32 %v3461_v47, %v1053_v6 }
 0x2b8   : > { %v1117_v9 = vmax.f32 %v1059_v5, 0.0 }
 0x2b9   : > { %1247 = vst.msk [vmem:[#allocation3 + $0x58] sm:$0xff] %vm770_vm2, %v1231_v7  ;;  %v1116_v10 = vmax.f32 %v1054_v8, 0.0  ;;  %v2377_v11 = vpop.f32.mrb[26].mxu1 }
 0x2ba   : > { %v1069_v12 = vadd.f32 %v2377_v11, %v3461_v47  ;;  %v1063_v13 = vpop.f32.mrb[27].mxu1 }
 0x2bb   : > { %v1232_v14 = vpack.c.bf16 %v1117_v9, %v1116_v10  ;;  %v1064_v15 = vadd.f32 %v3461_v47, %v1063_v13 }
 0x2bc   : > { %v1119_v16 = vmax.f32 %v1069_v12, 0.0 }
 0x2bd   : > { %1248 = vst.msk [vmem:[#allocation3 + $0x60] sm:$0xff] %vm770_vm2, %v1232_v14  ;;  %v1118_v17 = vmax.f32 %v1064_v15, 0.0  ;;  %v2380_v18 = vpop.f32.mrb[28].mxu1 }
 0x2be   : > { %v1079_v19 = vadd.f32 %v2380_v18, %v3461_v47  ;;  %v1073_v20 = vpop.f32.mrb[29].mxu1 }
 0x2bf   : > { %v1233_v21 = vpack.c.bf16 %v1119_v16, %v1118_v17  ;;  %v1074_v22 = vadd.f32 %v3461_v47, %v1073_v20 }
 0x2c0   : > { %v1121_v23 = vmax.f32 %v1079_v19, 0.0 }
 0x2c1   : > { %1249 = vst.msk [vmem:[#allocation3 + $0x68] sm:$0xff] %vm770_vm2, %v1233_v21  ;;  %v1120_v24 = vmax.f32 %v1074_v22, 0.0  ;;  %v2383_v25 = vpop.f32.mrb[30].mxu1 }
 0x2c2   : > { %v1089_v26 = vadd.f32 %v2383_v25, %v3461_v47  ;;  %v1083_v27 = vpop.f32.mrb[31].mxu1 }
 0x2c3   : > { %v1234_v28 = vpack.c.bf16 %v1121_v23, %v1120_v24  ;;  %v1084_v29 = vadd.f32 %v3461_v47, %v1083_v27 }
 0x2c4   : > { %v1123_v30 = vmax.f32 %v1089_v26, 0.0 }
 0x2c5   : > { %1250 = vst.msk [vmem:[#allocation3 + $0x70] sm:$0xff] %vm770_vm2, %v1234_v28  ;;  %v1122_v31 = vmax.f32 %v1084_v29, 0.0 }
 0x2c7   : > { %v1235_v32 = vpack.c.bf16 %v1123_v30, %v1122_v31 }
 0x2c9   : > { %1251 = vst.msk [vmem:[#allocation3 + $0x78] sm:$0xff] %vm770_vm2, %v1235_v32 }
 0x2ca PF: > { %v1273_v45 = vld [vmem:[#allocation2 + $0x40] sm:$0xff]  ;;  %s4006_s9 = sld [smem:[#allocation22_spill]]  ;;  %vm1281_vm3 = vcmask 261120   ;;  %v1274_v34 = vld [vmem:[#allocation2 + $0x48] sm:$0xff]  ;;  %v1275_v38 = vld [vmem:[#allocation2 + $0x50] sm:$0xff]  ;;  %s4007_s24 = sld [smem:[#allocation23_spill]] }
 0x2cb   : > { %v1265_v33 = vld [vmem:[#allocation2] sm:$0xff]  ;;  %2400 = vmatprep.subr.msk.bf16.mxu0 %vm1281_vm3, %v1273_v45  ;;  %v1266_v47 = vld [vmem:[#allocation2 + $0x8] sm:$0xff]  ;;  %v1267_v39 = vld [vmem:[#allocation2 + $0x10] sm:$0xff]  ;;  %s4008_s8 = sld [smem:[#allocation24_spill]]  ;;  %s1895_s11 = sshll.u32 %s3296_s27, 4  ;;  %s3850_s11 = int_to_ptr.vmem [resolvable:$true] %s1895_s11 }
 0x2cc   : > { %v1307_v35 = vsel %vm1281_vm3, %v1265_v33, 0  ;;  %v1310_v37 = vsel %vm1281_vm3, %v1266_v47, 0  ;;  %v1313_v40 = vsel %vm1281_vm3, %v1267_v39, 0  ;;  %v1276_v41 = vld [vmem:[#allocation2 + $0x58] sm:$0xff]  ;;  %v1277_v44 = vld [vmem:[#allocation2 + $0x60] sm:$0xff]  ;;  %v1278_v49 = vld [vmem:[#allocation2 + $0x68] sm:$0xff] }
 0x2cd   : > { %2239 = vmatpush3.bf16.xpose.msra.mxu0 %v1307_v35  ;;  %v1268_v42 = vld [vmem:[#allocation2 + $0x18] sm:$0xff]  ;;  %v1269_v46 = vld [vmem:[#allocation2 + $0x20] sm:$0xff]  ;;  %v1270_v50 = vld [vmem:[#allocation2 + $0x28] sm:$0xff]  ;;  %s2973_s0 = smov [#allocation14]  }
 0x2ce   : > { %2401 = vmatprep.subr.msk.bf16.mxu0 %vm1281_vm3, %v1274_v34  ;;  %v1316_v43 = vsel %vm1281_vm3, %v1268_v42, 0  ;;  %v1319_v48 = vsel %vm1281_vm3, %v1269_v46, 0  ;;  %v1322_v51 = vsel %vm1281_vm3, %v1270_v50, 0  ;;  %v1279_v52 = vld [vmem:[#allocation2 + $0x70] sm:$0xff]  ;;  %v1280_v55 = vld [vmem:[#allocation2 + $0x78] sm:$0xff] }
 0x2cf   : > { %v1271_v53 = vld [vmem:[#allocation2 + $0x30] sm:$0xff]  ;;  %v1272_v56 = vld [vmem:[#allocation2 + $0x38] sm:$0xff] }
 0x2d0   : > { %s2143_s5 = sshll.u32 %s4006_s9, 7  ;;  %v1325_v54 = vsel %vm1281_vm3, %v1271_v53, 0  ;;  %v1328_v57 = vsel %vm1281_vm3, %v1272_v56, 0  ;;  %s2164_s18 = sshll.u32 %s4006_s9, 5 }
 0x2d1   : > { %s1253_s6 = sshra.s32 %s2143_s5, 4  ;;  %s2159_s20 = sshll.u32 %s4007_s24, 6 }
 0x2d2   : > { %s2144_s1 = sshll.u32 %s1253_s6, 3  ;;  %s1892_s16 = sadd.s32 %s2164_s18, %s2159_s20 }
 0x2d3   : > { %s3515_s21 = scalar_lea.vmem [#allocation2], %s2144_s1  ;;  %s2160_s14 = sshll.u32 %s1892_s16, 7 }
 0x2d4   : > { %v1257_v36 = vld [vmem:[%s3515_s21] sm:$0xff]  ;;  %v1258_v58 = vld [vmem:[%s3515_s21 + $0x8] sm:$0xff]  ;;  %v1259_v59 = vld [vmem:[%s3515_s21 + $0x10] sm:$0xff]  ;;  %s4009_s5 = sld [smem:[#allocation31_spill]]  ;;  %s1862_s1 = scalar_lea.sflag [#allocation15], %s3290_s2 }
 0x2d5   : > { %2254 = vmatprep.mubr.msk.bf16.mxu0 %vm1281_vm3, %v1257_v36  ;;  %2241 = vmatpush3.bf16.xpose.msra.mxu0 %v1310_v37  ;;  %v1260_v60 = vld [vmem:[%s3515_s21 + $0x18] sm:$0xff]  ;;  %v1261_v61 = vld [vmem:[%s3515_s21 + $0x20] sm:$0xff]  ;;  %v1262_v62 = vld [vmem:[%s3515_s21 + $0x28] sm:$0xff]  ;;  %p4010_p6 = scmp.ne.s32.totalorder %s4008_s8, 0  ;;  %s2805_s18 = sshll.u32 %s2973_s0, 4  ;;  %s2806_s18 = int_to_ptr.vmem [resolvable:$false] %s2805_s18 }
 0x2d6   : > { %2402 = vmatprep.subr.msk.bf16.mxu0 %vm1281_vm3, %v1275_v38  ;;  %v1263_v63 = vld [vmem:[%s3515_s21 + $0x30] sm:$0xff]  ;;  %v1264_v0 = vld [vmem:[%s3515_s21 + $0x38] sm:$0xff]  ;;  %s2801_s21 = scalar_lea.vmem %s3850_s11, 4096  ;;  %p2808_p11 = scmp.lt.s32.totalorder %s3850_s11, %s2806_s18 }
 0x2d7   : > { %p2802_p4 = scmp.ne.s32.totalorder %s3850_s11, %s2801_s21 }
 0x2d9   : > { %p2803_p10 = pnand %p2802_p4, %p4010_p6 }
 0x2da   : > { %s3848_s6 = scalar_lea.hbm %s4009_s5, %s2160_s14 }
 0x2db   : > { %p2804_p13 = pneg %p2803_p10 }
 0x2dd   : > { %2243 = vmatpush3.bf16.xpose.msra.mxu0 %v1313_v40 }
 0x2de   : > { %2403 = vmatprep.subr.msk.bf16.mxu0 %vm1281_vm3, %v1276_v41 }
 0x2e5   : > { %2245 = vmatpush3.bf16.xpose.msra.mxu0 %v1316_v43 }
 0x2e6   : > { %2404 = vmatprep.subr.msk.bf16.mxu0 %vm1281_vm3, %v1277_v44 }
 0x2ed   : > { %2247 = vmatpush3.bf16.xpose.msra.mxu0 %v1319_v48 }
 0x2ee   : > { %2405 = vmatprep.subr.msk.bf16.mxu0 %vm1281_vm3, %v1278_v49 }
 0x2f5   : > { %2249 = vmatpush3.bf16.xpose.msra.mxu0 %v1322_v51 }
 0x2f6   : > { %2406 = vmatprep.subr.msk.bf16.mxu0 %vm1281_vm3, %v1279_v52 }
 0x2fd   : > { %2251 = vmatpush3.bf16.xpose.msra.mxu0 %v1325_v54 }
 0x2fe   : > { %2407 = vmatprep.subr.msk.bf16.mxu0 %vm1281_vm3, %v1280_v55 }
 0x305   : > { %2253 = vmatpush3.bf16.xpose.msra.mxu0 %v1328_v57 }
 0x30c   : > { %2255 = vmatmul.mubr.msk.bf16.vlgmr.msra.gmra.mrb[0].mxu0 %vm1281_vm3, %v1257_v36 }
 0x30d   : > { %2256 = vmatprep.mubr.msk.bf16.mxu0 %vm1281_vm3, %v1258_v58 }
 0x314   : > { %2257 = vmatmul.mubr.msk.bf16.gmra.mrb[4].mxu0 %vm1281_vm3, %v1258_v58 }
 0x315   : > { %2258 = vmatprep.mubr.msk.bf16.mxu0 %vm1281_vm3, %v1259_v59 }
 0x31c   : > { %2259 = vmatmul.mubr.msk.bf16.gmra.mrb[8].mxu0 %vm1281_vm3, %v1259_v59 }
 0x31d   : > { %2260 = vmatprep.mubr.msk.bf16.mxu0 %vm1281_vm3, %v1260_v60 }
 0x324   : > { %2261 = vmatmul.mubr.msk.bf16.gmra.mrb[12].mxu0 %vm1281_vm3, %v1260_v60 }
 0x325   : > { %2262 = vmatprep.mubr.msk.bf16.mxu0 %vm1281_vm3, %v1261_v61 }
 0x32c   : > { %2263 = vmatmul.mubr.msk.bf16.gmra.mrb[16].mxu0 %vm1281_vm3, %v1261_v61 }
 0x32d   : > { %2264 = vmatprep.mubr.msk.bf16.mxu0 %vm1281_vm3, %v1262_v62 }
 0x334   : > { %2265 = vmatmul.mubr.msk.bf16.gmra.mrb[20].mxu0 %vm1281_vm3, %v1262_v62 }
 0x335   : > { %2266 = vmatprep.mubr.msk.bf16.mxu0 %vm1281_vm3, %v1263_v63 }
 0x33c   : > { %2267 = vmatmul.mubr.msk.bf16.gmra.mrb[24].mxu0 %vm1281_vm3, %v1263_v63 }
 0x33d   : > { %2268 = vmatprep.mubr.msk.bf16.mxu0 %vm1281_vm3, %v1264_v0 }
 0x344   : > { %2269 = vmatmul.mubr.msk.bf16.gmra.mrb[28].mxu0 %vm1281_vm3, %v1264_v0 }
 0x3df   : > { %v3554_v1 = vpop.f32.mrb[0].mxu0 }
 0x3e0   : > { %v3556_v2 = vpop.f32.mrb[1].mxu0 }
 0x3e1   : > { %v3558_v3 = vpop.f32.mrb[2].mxu0  ;;  %v1467_v4 = vmax.f32 %v3554_v1, %v3556_v2 }
 0x3e2   : > { %v3562_v5 = vpop.f32.mrb[3].mxu0 }
 0x3e3   : > { %1468 = vmax.xlane.f32.xlu0 %v1467_v4  ;;  %v1470_v6 = vmax.f32 %v3558_v3, %v3562_v5 }
 0x3e7   : > { %1471 = vmax.xlane.f32.xlu0 %v1470_v6  ;;  %v3566_v7 = vpop.f32.mrb[4].mxu0 }
 0x3e8   : > { %v3568_v8 = vpop.f32.mrb[5].mxu0 }
 0x3e9   : > { %v3570_v9 = vpop.f32.mrb[6].mxu0  ;;  %v1473_v10 = vmax.f32 %v3566_v7, %v3568_v8 }
 0x3ea   : > { %v3574_v11 = vpop.f32.mrb[7].mxu0 }
 0x3eb   : > { %1474 = vmax.xlane.f32.xlu1 %v1473_v10  ;;  %v1476_v12 = vmax.f32 %v3570_v9, %v3574_v11 }
 0x3ef   : > { %1477 = vmax.xlane.f32.xlu1 %v1476_v12  ;;  %v3578_v13 = vpop.f32.mrb[8].mxu0 }
 0x3f0   : > { %v3580_v14 = vpop.f32.mrb[9].mxu0 }
 0x3f1   : > { %v3582_v15 = vpop.f32.mrb[10].mxu0  ;;  %v1479_v16 = vmax.f32 %v3578_v13, %v3580_v14 }
 0x3f2   : > { %v3586_v17 = vpop.f32.mrb[11].mxu0 }
 0x3f3   : > { %1480 = vmax.xlane.f32.xlu0 %v1479_v16  ;;  %v1482_v18 = vmax.f32 %v3582_v15, %v3586_v17 }
 0x3f5   : > { %1483 = vmax.xlane.f32.xlu1 %v1482_v18 }
 0x3f7   : > { %v3590_v19 = vpop.f32.mrb[12].mxu0 }
 0x3f8   : > { %v3592_v20 = vpop.f32.mrb[13].mxu0 }
 0x3f9   : > { %v3594_v21 = vpop.f32.mrb[14].mxu0  ;;  %v1485_v22 = vmax.f32 %v3590_v19, %v3592_v20 }
 0x3fa   : > { %v3598_v23 = vpop.f32.mrb[15].mxu0 }
 0x3fb   : > { %1486 = vmax.xlane.f32.xlu0 %v1485_v22  ;;  %v1488_v24 = vmax.f32 %v3594_v21, %v3598_v23 }
 0x3fd   : > { %1489 = vmax.xlane.f32.xlu1 %v1488_v24 }
 0x3ff   : > { %v3602_v25 = vpop.f32.mrb[16].mxu0 }
 0x400   : > { %v3604_v26 = vpop.f32.mrb[17].mxu0 }
 0x401   : > { %v3606_v27 = vpop.f32.mrb[18].mxu0  ;;  %v1491_v28 = vmax.f32 %v3602_v25, %v3604_v26 }
 0x402   : > { %v3610_v29 = vpop.f32.mrb[19].mxu0 }
 0x403   : > { %1492 = vmax.xlane.f32.xlu0 %v1491_v28  ;;  %v1494_v30 = vmax.f32 %v3606_v27, %v3610_v29 }
 0x405   : > { %1495 = vmax.xlane.f32.xlu1 %v1494_v30 }
 0x407   : > { %v3614_v31 = vpop.f32.mrb[20].mxu0 }
 0x408   : > { %v3616_v32 = vpop.f32.mrb[21].mxu0 }
 0x409   : > { %v3618_v45 = vpop.f32.mrb[22].mxu0  ;;  %v1497_v33 = vmax.f32 %v3614_v31, %v3616_v32 }
 0x40a   : > { %v3622_v34 = vpop.f32.mrb[23].mxu0 }
 0x40b   : > { %1498 = vmax.xlane.f32.xlu0 %v1497_v33  ;;  %v1500_v35 = vmax.f32 %v3618_v45, %v3622_v34 }
 0x40d   : > { %1501 = vmax.xlane.f32.xlu1 %v1500_v35 }
 0x40f   : > { %v3626_v47 = vpop.f32.mrb[24].mxu0 }
 0x410   : > { %v3628_v36 = vpop.f32.mrb[25].mxu0 }
 0x411   : > { %v3630_v37 = vpop.f32.mrb[26].mxu0  ;;  %v1503_v38 = vmax.f32 %v3626_v47, %v3628_v36 }
 0x412   : > { %v3634_v39 = vpop.f32.mrb[27].mxu0 }
 0x413   : > { %1504 = vmax.xlane.f32.xlu0 %v1503_v38  ;;  %v1506_v40 = vmax.f32 %v3630_v37, %v3634_v39 }
 0x415   : > { %1507 = vmax.xlane.f32.xlu1 %v1506_v40 }
 0x417   : > { %v3638_v41 = vpop.f32.mrb[28].mxu0 }
 0x418   : > { %v3640_v42 = vpop.f32.mrb[29].mxu0 }
 0x419   : > { %v3642_v43 = vpop.f32.mrb[30].mxu0  ;;  %v1509_v44 = vmax.f32 %v3638_v41, %v3640_v42 }
 0x41a   : > { %v3646_v46 = vpop.f32.mrb[31].mxu0 }
 0x41b   : > { %v1512_v48 = vmax.f32 %v3642_v43, %v3646_v46  ;;  %1510 = vmax.xlane.f32.xlu0 %v1509_v44 }
 0x41d   : > { %1513 = vmax.xlane.f32.xlu1 %v1512_v48 }
 0x470   : > { %v1469_v49 = vpop.xlane.xlu0 %1468 }
 0x471   : > { %v1515_v50 = vsub.f32 %v3554_v1, %v1469_v49  ;;  %v1516_v51 = vsub.f32 %v3556_v2, %v1469_v49 }
 0x473   : > { %v1547_v52 = vmul.f32 1.442695, %v1515_v50  ;;  %v1549_v53 = vmul.f32 1.442695, %v1516_v51 }
 0x474   : > { %v1472_v54 = vpop.xlane.xlu0 %1471 }
 0x475   : > { %2563 = vpow2.f32 %v1547_v52  ;;  %v1517_v55 = vsub.f32 %v3558_v3, %v1472_v54  ;;  %v1518_v56 = vsub.f32 %v3562_v5, %v1472_v54 }
 0x476   : > { %2565 = vpow2.f32 %v1549_v53 }
 0x477   : > { %v1551_v57 = vmul.f32 1.442695, %v1517_v55  ;;  %v1553_v58 = vmul.f32 1.442695, %v1518_v56 }
 0x478   : > { %v1475_v59 = vpop.xlane.xlu1 %1474 }
 0x479   : > { %2567 = vpow2.f32 %v1551_v57  ;;  %v1519_v60 = vsub.f32 %v3566_v7, %v1475_v59  ;;  %v1520_v61 = vsub.f32 %v3568_v8, %v1475_v59 }
 0x47a   : > { %2569 = vpow2.f32 %v1553_v58 }
 0x47b   : > { %v1555_v62 = vmul.f32 1.442695, %v1519_v60  ;;  %v1557_v63 = vmul.f32 1.442695, %v1520_v61 }
 0x47c   : > { %v1478_v0 = vpop.xlane.xlu1 %1477 }
 0x47d   : > { %2571 = vpow2.f32 %v1555_v62  ;;  %v1521_v1 = vsub.f32 %v3570_v9, %v1478_v0  ;;  %v1522_v2 = vsub.f32 %v3574_v11, %v1478_v0 }
 0x47e   : > { %2573 = vpow2.f32 %v1557_v63 }
 0x47f   : > { %v3658_v3 = vpop.eup %2563  ;;  %v1559_v4 = vmul.f32 1.442695, %v1521_v1  ;;  %v1561_v5 = vmul.f32 1.442695, %v1522_v2 }
 0x480   : > { %v3660_v6 = vpop.eup %2565  ;;  %v1481_v10 = vpop.xlane.xlu0 %1480 }
 0x481   : > { %2575 = vpow2.f32 %v1559_v4  ;;  %v1523_v7 = vsub.f32 %v3578_v13, %v1481_v10  ;;  %v1524_v8 = vsub.f32 %v3580_v14, %v1481_v10  ;;  %v1611_v12 = vadd.f32 %v3660_v6, %v3658_v3 }
 0x482   : > { %2577 = vpow2.f32 %v1561_v5  ;;  %v1484_v9 = vpop.xlane.xlu1 %1483 }
 0x483   : > { %v3666_v16 = vpop.eup %2567  ;;  %v1563_v11 = vmul.f32 1.442695, %v1523_v7  ;;  %v1565_v18 = vmul.f32 1.442695, %v1524_v8  ;;  %v1525_v22 = vsub.f32 %v3582_v15, %v1484_v9  ;;  %v1526_v24 = vsub.f32 %v3586_v17, %v1484_v9  ;;  %1612 = vadd.xlane.f32.xlu0 %v1611_v12 }
 0x484   : > { %v3670_v28 = vpop.eup %2569 }
 0x485   : > { %2579 = vpow2.f32 %v1563_v11  ;;  %v1567_v13 = vmul.f32 1.442695, %v1525_v22  ;;  %v1569_v30 = vmul.f32 1.442695, %v1526_v24  ;;  %v1614_v14 = vadd.f32 %v3670_v28, %v3666_v16 }
 0x486   : > { %2581 = vpow2.f32 %v1565_v18 }
 0x487   : > { %v3674_v33 = vpop.eup %2571  ;;  %2583 = vpow2.f32 %v1567_v13  ;;  %1615 = vadd.xlane.f32.xlu1 %v1614_v14 }
 0x488   : > { %v3676_v35 = vpop.eup %2573  ;;  %2585 = vpow2.f32 %v1569_v30  ;;  %v1487_v15 = vpop.xlane.xlu0 %1486 }
 0x489   : > { %v1527_v17 = vsub.f32 %v3590_v19, %v1487_v15  ;;  %v1528_v38 = vsub.f32 %v3592_v20, %v1487_v15  ;;  %v1617_v40 = vadd.f32 %v3676_v35, %v3674_v33 }
 0x48a   : > { %v1490_v44 = vpop.xlane.xlu1 %1489 }
 0x48b   : > { %v3682_v48 = vpop.eup %2575  ;;  %v1571_v49 = vmul.f32 1.442695, %v1527_v17  ;;  %v1573_v50 = vmul.f32 1.442695, %v1528_v38  ;;  %v1529_v51 = vsub.f32 %v3594_v21, %v1490_v44  ;;  %v1530_v52 = vsub.f32 %v3598_v23, %v1490_v44  ;;  %1618 = vadd.xlane.f32.xlu0 %v1617_v40 }
 0x48c   : > { %v3686_v53 = vpop.eup %2577 }
 0x48d   : > { %2587 = vpow2.f32 %v1571_v49  ;;  %v1575_v54 = vmul.f32 1.442695, %v1529_v51  ;;  %v1577_v19 = vmul.f32 1.442695, %v1530_v52  ;;  %v1620_v20 = vadd.f32 %v3686_v53, %v3682_v48 }
 0x48e   : > { %2589 = vpow2.f32 %v1573_v50 }
 0x48f   : > { %v3690_v55 = vpop.eup %2579  ;;  %2591 = vpow2.f32 %v1575_v54  ;;  %1621 = vadd.xlane.f32.xlu1 %v1620_v20 }
 0x490   : > { %v3692_v56 = vpop.eup %2581  ;;  %2593 = vpow2.f32 %v1577_v19  ;;  %v1493_v21 = vpop.xlane.xlu0 %1492 }
 0x491   : > { %v3694_v57 = vpop.eup %2583  ;;  %v1531_v23 = vsub.f32 %v3602_v25, %v1493_v21  ;;  %v1532_v58 = vsub.f32 %v3604_v26, %v1493_v21  ;;  %v1623_v59 = vadd.f32 %v3692_v56, %v3690_v55 }
 0x492   : > { %v3700_v60 = vpop.eup %2585  ;;  %v1496_v61 = vpop.xlane.xlu1 %1495 }
 0x493   : > { %v1579_v62 = vmul.f32 1.442695, %v1531_v23  ;;  %v1581_v63 = vmul.f32 1.442695, %v1532_v58  ;;  %v1533_v0 = vsub.f32 %v3606_v27, %v1496_v61  ;;  %v1534_v1 = vsub.f32 %v3610_v29, %v1496_v61  ;;  %1624 = vadd.xlane.f32.xlu0 %v1623_v59 }
 0x494   : > { %v1626_v2 = vadd.f32 %v3700_v60, %v3694_v57 }
 0x495   : > { %2595 = vpow2.f32 %v1579_v62  ;;  %v1583_v25 = vmul.f32 1.442695, %v1533_v0  ;;  %v1585_v4 = vmul.f32 1.442695, %v1534_v1 }
 0x496   : > { %2597 = vpow2.f32 %v1581_v63  ;;  %1627 = vadd.xlane.f32.xlu1 %v1626_v2 }
 0x497   : > { %v3706_v26 = vpop.eup %2587  ;;  %2599 = vpow2.f32 %v1583_v25 }
 0x498   : > { %v3708_v5 = vpop.eup %2589  ;;  %2601 = vpow2.f32 %v1585_v4  ;;  %v1499_v10 = vpop.xlane.xlu0 %1498 }
 0x499   : > { %v3710_v7 = vpop.eup %2591  ;;  %v1535_v27 = vsub.f32 %v3614_v31, %v1499_v10  ;;  %v1536_v29 = vsub.f32 %v3616_v32, %v1499_v10  ;;  %v1629_v8 = vadd.f32 %v3708_v5, %v3706_v26 }
 0x49a   : > { %v3716_v12 = vpop.eup %2593  ;;  %v1502_v9 = vpop.xlane.xlu1 %1501 }
 0x49b   : > { %v1587_v11 = vmul.f32 1.442695, %v1535_v27  ;;  %v1589_v18 = vmul.f32 1.442695, %v1536_v29  ;;  %v1537_v22 = vsub.f32 %v3618_v45, %v1502_v9  ;;  %v1538_v24 = vsub.f32 %v3622_v34, %v1502_v9  ;;  %1630 = vadd.xlane.f32.xlu0 %v1629_v8 }
 0x49c   : > { %v1632_v13 = vadd.f32 %v3716_v12, %v3710_v7 }
 0x49d   : > { %2603 = vpow2.f32 %v1587_v11  ;;  %v1591_v31 = vmul.f32 1.442695, %v1537_v22  ;;  %v1593_v30 = vmul.f32 1.442695, %v1538_v24  ;;  %v1715_v24 = vld [vmem:[#allocation3 + $0x40] sm:$0xff] }
 0x49e   : > { %2605 = vpow2.f32 %v1589_v18  ;;  %1633 = vadd.xlane.f32.xlu1 %v1632_v13  ;;  %v1707_v13 = vld [vmem:[#allocation3] sm:$0xff] }
 0x49f   : > { %v3722_v32 = vpop.eup %2595  ;;  %2607 = vpow2.f32 %v1591_v31  ;;  %v1716_v31 = vld [vmem:[#allocation3 + $0x48] sm:$0xff] }
 0x4a0   : > { %v3724_v14 = vpop.eup %2597  ;;  %2609 = vpow2.f32 %v1593_v30  ;;  %v1505_v15 = vpop.xlane.xlu0 %1504  ;;  %v1708_v30 = vld [vmem:[#allocation3 + $0x8] sm:$0xff] }
 0x4a1   : > { %v3726_v17 = vpop.eup %2599  ;;  %v1539_v45 = vsub.f32 %v3626_v47, %v1505_v15  ;;  %v1540_v34 = vsub.f32 %v3628_v36, %v1505_v15  ;;  %v1635_v38 = vadd.f32 %v3724_v14, %v3722_v32  ;;  %v1717_v15 = vld [vmem:[#allocation3 + $0x50] sm:$0xff] }
 0x4a2   : > { %v3732_v40 = vpop.eup %2601  ;;  %v1508_v44 = vpop.xlane.xlu1 %1507 }
 0x4a3   : > { %v1595_v49 = vmul.f32 1.442695, %v1539_v45  ;;  %v1597_v50 = vmul.f32 1.442695, %v1540_v34  ;;  %v1541_v51 = vsub.f32 %v3630_v37, %v1508_v44  ;;  %v1542_v52 = vsub.f32 %v3634_v39, %v1508_v44  ;;  %1636 = vadd.xlane.f32.xlu0 %v1635_v38  ;;  %v1709_v45 = vld [vmem:[#allocation3 + $0x10] sm:$0xff]  ;;  %v1718_v34 = vld [vmem:[#allocation3 + $0x58] sm:$0xff] }
 0x4a4   : > { %v1638_v54 = vadd.f32 %v3732_v40, %v3726_v17  ;;  %v1710_v38 = vld [vmem:[#allocation3 + $0x18] sm:$0xff]  ;;  %v1719_v44 = vld [vmem:[#allocation3 + $0x60] sm:$0xff] }
 0x4a5   : > { %2611 = vpow2.f32 %v1595_v49  ;;  %v1599_v47 = vmul.f32 1.442695, %v1541_v51  ;;  %v1601_v19 = vmul.f32 1.442695, %v1542_v52  ;;  %v1711_v49 = vld [vmem:[#allocation3 + $0x20] sm:$0xff]  ;;  %v1712_v51 = vld [vmem:[#allocation3 + $0x28] sm:$0xff] }
 0x4a6   : > { %2613 = vpow2.f32 %v1597_v50  ;;  %1639 = vadd.xlane.f32.xlu1 %v1638_v54  ;;  %v1720_v50 = vld [vmem:[#allocation3 + $0x68] sm:$0xff]  ;;  %v1721_v52 = vld [vmem:[#allocation3 + $0x70] sm:$0xff] }
 0x4a7   : > { %v3738_v36 = vpop.eup %2603  ;;  %2615 = vpow2.f32 %v1599_v47  ;;  %v1713_v54 = vld [vmem:[#allocation3 + $0x30] sm:$0xff]  ;;  %v1722_v47 = vld [vmem:[#allocation3 + $0x78] sm:$0xff] }
 0x4a8   : > { %v3740_v20 = vpop.eup %2605  ;;  %2617 = vpow2.f32 %v1601_v19  ;;  %v1511_v21 = vpop.xlane.xlu0 %1510  ;;  %v1714_v19 = vld [vmem:[#allocation3 + $0x38] sm:$0xff] }
 0x4a9   : > { %v3742_v23 = vpop.eup %2607  ;;  %v1543_v37 = vsub.f32 %v3638_v41, %v1511_v21  ;;  %v1544_v39 = vsub.f32 %v3640_v42, %v1511_v21  ;;  %v1641_v58 = vadd.f32 %v3740_v20, %v3738_v36 }
 0x4aa   : > { %v3748_v59 = vpop.eup %2609  ;;  %v1514_v61 = vpop.xlane.xlu1 %1513 }
 0x4ab   : > { %v1603_v62 = vmul.f32 1.442695, %v1543_v37  ;;  %v1605_v63 = vmul.f32 1.442695, %v1544_v39  ;;  %1642 = vadd.xlane.f32.xlu0 %v1641_v58  ;;  %v1545_v0 = vsub.f32 %v3642_v43, %v1514_v61  ;;  %v1546_v1 = vsub.f32 %v3646_v46, %v1514_v61 }
 0x4ac   : > { %v1644_v2 = vadd.f32 %v3748_v59, %v3742_v23 }
 0x4ad   : > { %2619 = vpow2.f32 %v1603_v62  ;;  %v1607_v41 = vmul.f32 1.442695, %v1545_v0  ;;  %v1609_v25 = vmul.f32 1.442695, %v1546_v1 }
 0x4ae   : > { %2621 = vpow2.f32 %v1605_v63  ;;  %1645 = vadd.xlane.f32.xlu1 %v1644_v2 }
 0x4af   : > { %v3754_v42 = vpop.eup %2611  ;;  %2623 = vpow2.f32 %v1607_v41 }
 0x4b0   : > { %v3756_v4 = vpop.eup %2613  ;;  %2625 = vpow2.f32 %v1609_v25 }
 0x4b1   : > { %v3758_v10 = vpop.eup %2615  ;;  %v1647_v43 = vadd.f32 %v3756_v4, %v3754_v42 }
 0x4b2   : > { %v3762_v46 = vpop.eup %2617 }
 0x4b3   : > { %1648 = vadd.xlane.f32.xlu0 %v1647_v43  ;;  %v1650_v27 = vadd.f32 %v3762_v46, %v3758_v10 }
 0x4b5   : > { %1651 = vadd.xlane.f32.xlu1 %v1650_v27 }
 0x4b7   : > { %v3766_v29 = vpop.eup %2619 }
 0x4b8   : > { %v3768_v8 = vpop.eup %2621 }
 0x4b9   : > { %v3770_v9 = vpop.eup %2623  ;;  %v1653_v11 = vadd.f32 %v3768_v8, %v3766_v29 }
 0x4ba   : > { %v3774_v18 = vpop.eup %2625 }
 0x4bb   : > { %1654 = vadd.xlane.f32.xlu0 %v1653_v11  ;;  %v1656_v22 = vadd.f32 %v3774_v18, %v3770_v9 }
 0x4bd   : > { %1657 = vadd.xlane.f32.xlu1 %v1656_v22 }
 0x4e8   : > { %1755 = vxpose.xlu0.c.b16.start [1/8] (narrow) %v1715_v24, 32 }
 0x4ea   : > { %1739 = vxpose.xlu1.c.b16.start [1/8] (narrow) %v1707_v13, 32 }
 0x4ec   : > { %1756 = vxpose.xlu0.c.b16.cont [2/8] (narrow) %v1716_v31, 32 }
 0x4ee   : > { %1740 = vxpose.xlu1.c.b16.cont [2/8] (narrow) %v1708_v30, 32 }
 0x4f0   : > { %1757 = vxpose.xlu0.c.b16.cont [3/8] (narrow) %v1717_v15, 32 }
 0x4f2   : > { %1741 = vxpose.xlu1.c.b16.cont [3/8] (narrow) %v1709_v45, 32 }
 0x4f4   : > { %1758 = vxpose.xlu0.c.b16.cont [4/8] (narrow) %v1718_v34, 32 }
 0x4f6   : > { %1742 = vxpose.xlu1.c.b16.cont [4/8] (narrow) %v1710_v38, 32 }
 0x4f8   : > { %1759 = vxpose.xlu0.c.b16.cont [5/8] (narrow) %v1719_v44, 32 }
 0x4fa   : > { %1743 = vxpose.xlu1.c.b16.cont [5/8] (narrow) %v1711_v49, 32 }
 0x4fc   : > { %1760 = vxpose.xlu0.c.b16.cont [6/8] (narrow) %v1720_v50, 32 }
 0x4fe   : > { %1744 = vxpose.xlu1.c.b16.cont [6/8] (narrow) %v1712_v51, 32 }
 0x500   : > { %1761 = vxpose.xlu0.c.b16.cont [7/8] (narrow) %v1721_v52, 32 }
 0x502   : > { %1745 = vxpose.xlu1.c.b16.cont [7/8] (narrow) %v1713_v54, 32 }
 0x504   : > { %1762 = vxpose.xlu0.c.b16.end [8/8] (narrow) %v1722_v47, 32 }
 0x506   : > { %1746 = vxpose.xlu1.c.b16.end [8/8] (narrow) %v1714_v19, 32 }
 0x510   : > { %v1613_v21 = vpop.xlane.xlu0 %1612 }
 0x511   : > { %2627 = vrcp.f32 %v1613_v21 }
 0x514   : > { %v1616_v37 = vpop.xlane.xlu1 %1615 }
 0x515   : > { %2629 = vrcp.f32 %v1616_v37 }
 0x518   : > { %v1619_v39 = vpop.xlane.xlu0 %1618 }
 0x519   : > { %2631 = vrcp.f32 %v1619_v39 }
 0x51b   : > { %v2628_v58 = vpop.eup %2627 }
 0x51c   : > { %v1622_v61 = vpop.xlane.xlu1 %1621  ;;  %v1676_v62 = vmul.f32 %v2628_v58, %v3660_v6  ;;  %v1675_v63 = vmul.f32 %v2628_v58, %v3658_v3 }
 0x51d   : > { %2633 = vrcp.f32 %v1622_v61 }
 0x51e   : > { %1821 = vst [vmem:[%s3296_s27 + $0x8] sm:$0xff] %v1676_v62  ;;  %1820 = vst [vmem:[%s3296_s27] sm:$0xff] %v1675_v63 }
 0x51f   : > { %v2630_v0 = vpop.eup %2629 }
 0x520   : > { %v1625_v1 = vpop.xlane.xlu0 %1624  ;;  %v1678_v2 = vmul.f32 %v2630_v0, %v3670_v28  ;;  %v1677_v41 = vmul.f32 %v2630_v0, %v3666_v16 }
 0x521   : > { %2635 = vrcp.f32 %v1625_v1 }
 0x522   : > { %v1724_v25 = vpack.c.bf16 %v1678_v2, %v1676_v62  ;;  %1823 = vst [vmem:[%s3296_s27 + $0x18] sm:$0xff] %v1678_v2  ;;  %v1723_v43 = vpack.c.bf16 %v1677_v41, %v1675_v63  ;;  %1822 = vst [vmem:[%s3296_s27 + $0x10] sm:$0xff] %v1677_v41 }
 0x523   : > { %v2632_v6 = vpop.eup %2631  ;;  %v1628_v27 = vpop.xlane.xlu1 %1627 }
 0x524   : > { %2637 = vrcp.f32 %v1628_v27  ;;  %1771 = vmatprep.subr.bf16.mxu1 %v1724_v25  ;;  %v1680_v3 = vmul.f32 %v2632_v6, %v3676_v35  ;;  %v1679_v11 = vmul.f32 %v2632_v6, %v3674_v33 }
 0x525   : > { %1772 = vmatpush1.bf16.xpose.msra.mxu1 %v1723_v43 }
 0x526   : > { %1825 = vst [vmem:[%s3296_s27 + $0x28] sm:$0xff] %v1680_v3  ;;  %1824 = vst [vmem:[%s3296_s27 + $0x20] sm:$0xff] %v1679_v11 }
 0x527   : > { %v2634_v28 = vpop.eup %2633 }
 0x528   : > { %v1631_v16 = vpop.xlane.xlu0 %1630  ;;  %v1682_v22 = vmul.f32 %v2634_v28, %v3686_v53  ;;  %v1681_v24 = vmul.f32 %v2634_v28, %v3682_v48 }
 0x529   : > { %2639 = vrcp.f32 %v1631_v16 }
 0x52a   : > { %v1726_v13 = vpack.c.bf16 %v1682_v22, %v1680_v3  ;;  %1827 = vst [vmem:[%s3296_s27 + $0x38] sm:$0xff] %v1682_v22  ;;  %v1725_v31 = vpack.c.bf16 %v1681_v24, %v1679_v11  ;;  %1826 = vst [vmem:[%s3296_s27 + $0x30] sm:$0xff] %v1681_v24 }
 0x52b   : > { %v2636_v35 = vpop.eup %2635  ;;  %v1634_v33 = vpop.xlane.xlu1 %1633 }
 0x52c   : > { %2641 = vrcp.f32 %v1634_v33  ;;  %1773 = vmatprep.subr.bf16.mxu1 %v1726_v13  ;;  %v1684_v30 = vmul.f32 %v2636_v35, %v3692_v56  ;;  %v1683_v15 = vmul.f32 %v2636_v35, %v3690_v55 }
 0x52d   : > { %1774 = vmatpush1.bf16.xpose.msra.mxu1 %v1725_v31 }
 0x52e   : > { %v2638_v53 = vpop.eup %2637  ;;  %1829 = vst [vmem:[%s3296_s27 + $0x48] sm:$0xff] %v1684_v30  ;;  %1828 = vst [vmem:[%s3296_s27 + $0x40] sm:$0xff] %v1683_v15 }
 0x52f   : > { %v1686_v48 = vmul.f32 %v2638_v53, %v3700_v60  ;;  %v1685_v45 = vmul.f32 %v2638_v53, %v3694_v57 }
 0x530   : > { %v1637_v34 = vpop.xlane.xlu0 %1636 }
 0x531   : > { %2643 = vrcp.f32 %v1637_v34  ;;  %v1728_v38 = vpack.c.bf16 %v1686_v48, %v1684_v30  ;;  %1831 = vst [vmem:[%s3296_s27 + $0x58] sm:$0xff] %v1686_v48  ;;  %1830 = vst [vmem:[%s3296_s27 + $0x50] sm:$0xff] %v1685_v45  ;;  %v1727_v56 = vpack.c.bf16 %v1685_v45, %v1683_v15 }
 0x533   : > { %v2640_v44 = vpop.eup %2639  ;;  %1775 = vmatprep.subr.bf16.mxu1 %v1728_v38  ;;  %v1640_v55 = vpop.xlane.xlu1 %1639 }
 0x534   : > { %2645 = vrcp.f32 %v1640_v55  ;;  %v1688_v49 = vmul.f32 %v2640_v44, %v3708_v5  ;;  %v1687_v60 = vmul.f32 %v2640_v44, %v3706_v26 }
 0x535   : > { %1776 = vmatpush1.bf16.xpose.msra.mxu1 %v1727_v56 }
 0x536   : > { %v2642_v50 = vpop.eup %2641  ;;  %1833 = vst [vmem:[%s3296_s27 + $0x68] sm:$0xff] %v1688_v49  ;;  %1832 = vst [vmem:[%s3296_s27 + $0x60] sm:$0xff] %v1687_v60 }
 0x537   : > { %v1690_v57 = vmul.f32 %v2642_v50, %v3716_v12  ;;  %v1689_v51 = vmul.f32 %v2642_v50, %v3710_v7 }
 0x538   : > { %v1643_v52 = vpop.xlane.xlu0 %1642 }
 0x539   : > { %2647 = vrcp.f32 %v1643_v52  ;;  %v1730_v54 = vpack.c.bf16 %v1690_v57, %v1688_v49  ;;  %1835 = vst [vmem:[%s3296_s27 + $0x78] sm:$0xff] %v1690_v57  ;;  %1834 = vst [vmem:[%s3296_s27 + $0x70] sm:$0xff] %v1689_v51  ;;  %v1729_v5 = vpack.c.bf16 %v1689_v51, %v1687_v60 }
 0x53b   : > { %v2644_v47 = vpop.eup %2643  ;;  %1777 = vmatprep.subr.bf16.mxu1 %v1730_v54  ;;  %v1646_v26 = vpop.xlane.xlu1 %1645 }
 0x53c   : > { %2649 = vrcp.f32 %v1646_v26  ;;  %v1692_v19 = vmul.f32 %v2644_v47, %v3724_v14  ;;  %v1691_v12 = vmul.f32 %v2644_v47, %v3722_v32 }
 0x53d   : > { %1778 = vmatpush1.bf16.xpose.msra.mxu1 %v1729_v5 }
 0x53e   : > { %v2646_v21 = vpop.eup %2645  ;;  %1837 = vst [vmem:[%s3296_s27 + $0x88] sm:$0xff] %v1692_v19  ;;  %1836 = vst [vmem:[%s3296_s27 + $0x80] sm:$0xff] %v1691_v12 }
 0x53f   : > { %v1694_v7 = vmul.f32 %v2646_v21, %v3732_v40  ;;  %v1693_v37 = vmul.f32 %v2646_v21, %v3726_v17 }
 0x540   : > { %v1649_v39 = vpop.xlane.xlu0 %1648 }
 0x541   : > { %2651 = vrcp.f32 %v1649_v39  ;;  %v1732_v58 = vpack.c.bf16 %v1694_v7, %v1692_v19  ;;  %1839 = vst [vmem:[%s3296_s27 + $0x98] sm:$0xff] %v1694_v7  ;;  %1838 = vst [vmem:[%s3296_s27 + $0x90] sm:$0xff] %v1693_v37  ;;  %v1731_v32 = vpack.c.bf16 %v1693_v37, %v1691_v12 }
 0x542   : > { %v1652_v61 = vpop.xlane.xlu1 %1651 }
 0x543   : > { %v2648_v14 = vpop.eup %2647  ;;  %1779 = vmatprep.subr.bf16.mxu1 %v1732_v58  ;;  %2653 = vrcp.f32 %v1652_v61 }
 0x544   : > { %v1696_v62 = vmul.f32 %v2648_v14, %v3740_v20  ;;  %v1695_v40 = vmul.f32 %v2648_v14, %v3738_v36 }
 0x545   : > { %1780 = vmatpush1.bf16.xpose.msra.mxu1 %v1731_v32 }
 0x546   : > { %v2650_v63 = vpop.eup %2649  ;;  %1841 = vst [vmem:[%s3296_s27 + $0xa8] sm:$0xff] %v1696_v62  ;;  %1840 = vst [vmem:[%s3296_s27 + $0xa0] sm:$0xff] %v1695_v40 }
 0x547   : > { %v1698_v17 = vmul.f32 %v2650_v63, %v3748_v59  ;;  %v1697_v0 = vmul.f32 %v2650_v63, %v3742_v23 }
 0x548   : > { %v1655_v1 = vpop.xlane.xlu0 %1654 }
 0x549   : > { %2655 = vrcp.f32 %v1655_v1  ;;  %v1734_v2 = vpack.c.bf16 %v1698_v17, %v1696_v62  ;;  %1843 = vst [vmem:[%s3296_s27 + $0xb8] sm:$0xff] %v1698_v17  ;;  %1842 = vst [vmem:[%s3296_s27 + $0xb0] sm:$0xff] %v1697_v0  ;;  %v1733_v36 = vpack.c.bf16 %v1697_v0, %v1695_v40 }
 0x54a   : > { %v1658_v41 = vpop.xlane.xlu1 %1657 }
 0x54b   : > { %v2652_v20 = vpop.eup %2651  ;;  %1781 = vmatprep.subr.bf16.mxu1 %v1734_v2  ;;  %2657 = vrcp.f32 %v1658_v41 }
 0x54c   : > { %v1700_v25 = vmul.f32 %v2652_v20, %v3756_v4  ;;  %v1699_v59 = vmul.f32 %v2652_v20, %v3754_v42 }
 0x54d   : > { %v2654_v43 = vpop.eup %2653  ;;  %1782 = vmatpush1.bf16.xpose.msra.mxu1 %v1733_v36 }
 0x54e   : > { %v1702_v23 = vmul.f32 %v2654_v43, %v3762_v46  ;;  %1845 = vst [vmem:[%s3296_s27 + $0xc8] sm:$0xff] %v1700_v25  ;;  %v1701_v6 = vmul.f32 %v2654_v43, %v3758_v10  ;;  %1844 = vst [vmem:[%s3296_s27 + $0xc0] sm:$0xff] %v1699_v59  ;;  %v1763_v27 = vpop.trf.xlu0 }
 0x54f   : > { %1803 = vmatprep.mubr.bf16.mxu1 %v1763_v27 }
 0x550   : > { %v1736_v3 = vpack.c.bf16 %v1702_v23, %v1700_v25  ;;  %1847 = vst [vmem:[%s3296_s27 + $0xd8] sm:$0xff] %v1702_v23  ;;  %1846 = vst [vmem:[%s3296_s27 + $0xd0] sm:$0xff] %v1701_v6  ;;  %v1735_v42 = vpack.c.bf16 %v1701_v6, %v1699_v59 }
 0x552   : > { %1783 = vmatprep.subr.bf16.mxu1 %v1736_v3 }
 0x553   : > { %v2656_v4 = vpop.eup %2655 }
 0x554   : > { %v1704_v11 = vmul.f32 %v2656_v4, %v3768_v8  ;;  %v1703_v46 = vmul.f32 %v2656_v4, %v3766_v29  ;;  %v1747_v8 = vpop.trf.xlu1  ;;  %v1764_v29 = vpop.trf.xlu0 }
 0x555   : > { %v2658_v28 = vpop.eup %2657  ;;  %1784 = vmatpush1.bf16.xpose.msra.mxu1 %v1735_v42 }
 0x556   : > { %v1706_v10 = vmul.f32 %v2658_v28, %v3774_v18  ;;  %1849 = vst [vmem:[%s3296_s27 + $0xe8] sm:$0xff] %v1704_v11  ;;  %v1705_v16 = vmul.f32 %v2658_v28, %v3770_v9  ;;  %1848 = vst [vmem:[%s3296_s27 + $0xe0] sm:$0xff] %v1703_v46 }
 0x558   : > { %v1738_v22 = vpack.c.bf16 %v1706_v10, %v1704_v11  ;;  %1851 = vst [vmem:[%s3296_s27 + $0xf8] sm:$0xff] %v1706_v10  ;;  %1850 = vst [vmem:[%s3296_s27 + $0xf0] sm:$0xff] %v1705_v16  ;;  %v1737_v24 = vpack.c.bf16 %v1705_v16, %v1703_v46  ;;  %v1748_v18 = vpop.trf.xlu1  ;;  %s2807_s27 = scalar_lea.vmem %s2806_s18, 8192 }
 0x559   : > { %p2809_p0 = scmp.lt.s32.totalorder %s2807_s27, %s2801_s21 }
 0x55a   : > { %1785 = vmatprep.subr.bf16.mxu1 %v1738_v22 }
 0x55b   : > { %p2810_p5 = por %p2809_p0, %p2808_p11 }
 0x55d   : > { %1786 = vmatpush1.bf16.xpose.msra.mxu1 %v1737_v24  ;;  %p2811_p8 = pnand %p2810_p5, %p2804_p13 }
 0x564   : > { %1804 = vmatmul.mubr.bf16.vlgmr.msra.gmra.mrb[0].mxu1 %v1747_v8 }
 0x565   : > { %1811 = vmatprep.mubr.bf16.mxu1 %v1764_v29 }
 0x56c   : > { %1812 = vmatmul.mubr.bf16.gmra.mrb[4].mxu1 %v1748_v18 }
 0x56d   : > { %2814 = shalt.err (!%p2811_p8)
}
 0x56e   : > { %s2815_s20 = scalar_lea.hbm %s3848_s6, 4096  ;;  %s2819_s0 = scalar_lea.hbm %s4009_s5, 16384 }
 0x56f   : > { %p2816_p12 = scmp.ne.s32.totalorder %s3848_s6, %s2815_s20  ;;  %p2820_p9 = scmp.lt.u32.totalorder %s3848_s6, %s4009_s5 }
 0x570   : > { %p2821_p1 = scmp.lt.u32.totalorder %s2819_s0, %s2815_s20  ;;  %p2823_p4 = scmp.lt.u32.totalorder %s2815_s20, %s3848_s6 }
 0x571   : > { %p2817_p2 = pnand %p2816_p12, %p4010_p6 }
 0x572   : > { %p2822_p3 = por %p2821_p1, %p2820_p9 }
 0x573   : > { %p2818_p7 = pneg %p2817_p2 }
 0x574   : > { %p2824_p10 = por %p2823_p4, %p2822_p3 }
 0x576   : > { %p2825_p13 = pnand %p2824_p10, %p2818_p7 }
 0x578   : > { %2828 = shalt.err (!%p2825_p13)
}
 0x579   : > { %s2974_s21 = smov 256   ;;  %s2975_s18 = smov 16  }
 0x57a   : > { %2427 = dma.vmem_to_hbm [thread:$0]  (%p4010_p6), %s3850_s11, 4096, %s3848_s6, %s1862_s1, %s2974_s21, %s2974_s21, %s2975_s18  }
 0x57b   : > { %s2155_s27 = sshll.u32 %s4007_s24, 3  ;;  %s1876_s14 = sshll.u32 %s3294_s13, 4  ;;  %s3888_s14 = int_to_ptr.vmem [resolvable:$true] %s1876_s14 }
 0x57c   : > { %s1873_s20 = sadd.s32 %s4006_s9, %s2155_s27  ;;  %s4011_s10 = sld [smem:[#allocation30_spill]] }
 0x57d   : > { %s2156_s16 = sshll.u32 %s1873_s20, 7  ;;  %s1857_s9 = scalar_lea.sflag [#allocation6], %s3290_s2 }
 0x57e   : > { %s2829_s24 = scalar_lea.vmem %s3888_s14, 512  ;;  %s2976_s11 = smov [#allocation13]  }
 0x57f   : > { %p2830_p11 = scmp.ne.s32.totalorder %s3888_s14, %s2829_s24  ;;  %s2833_s6 = sshll.u32 %s2976_s11, 4  ;;  %s2834_s6 = int_to_ptr.vmem [resolvable:$false] %s2833_s6 }
 0x580   : > { %s2835_s1 = scalar_lea.vmem %s2834_s6, 1024  ;;  %p2836_p8 = scmp.lt.s32.totalorder %s3888_s14, %s2834_s6 }
 0x581   : > { %p2831_p0 = pnand %p2830_p11, %p4010_p6  ;;  %p2837_p12 = scmp.lt.s32.totalorder %s2835_s1, %s2829_s24 }
 0x582   : > { %s3886_s3 = scalar_lea.hbm %s4011_s10, %s2156_s16 }
 0x583   : > { %p2832_p5 = pneg %p2831_p0  ;;  %p2838_p2 = por %p2837_p12, %p2836_p8 }
 0x585   : > { %p2839_p7 = pnand %p2838_p2, %p2832_p5 }
 0x637   : > { %v1805_v9 = vpop.f32.mrb[0].mxu1 }
 0x638   : > { %1852 = vst [vmem:[%s3294_s13] sm:$0xff] %v1805_v9  ;;  %v1807_v13 = vpop.f32.mrb[1].mxu1 }
 0x639   : > { %v1808_v31 = vpop.f32.mrb[2].mxu1 }
 0x63a   : > { %1853 = vst [vmem:[%s3294_s13 + $0x8] sm:$0xff] %v1808_v31  ;;  %v1810_v35 = vpop.f32.mrb[3].mxu1 }
 0x63f   : > { %v1813_v33 = vpop.f32.mrb[4].mxu1 }
 0x640   : > { %1854 = vst [vmem:[%s3294_s13 + $0x10] sm:$0xff] %v1813_v33  ;;  %v1815_v30 = vpop.f32.mrb[5].mxu1 }
 0x641   : > { %v1816_v15 = vpop.f32.mrb[6].mxu1 }
 0x642   : > { %1855 = vst [vmem:[%s3294_s13 + $0x18] sm:$0xff] %v1816_v15  ;;  %v1818_v53 = vpop.f32.mrb[7].mxu1 }
 0x643   : > { %2842 = shalt.err (!%p2839_p7)
}
 0x644   : > { %s2843_s13 = scalar_lea.hbm %s3886_s3, 512  ;;  %s2847_s20 = scalar_lea.hbm %s4011_s10, 2048 }
 0x645   : > { %p2844_p9 = scmp.ne.s32.totalorder %s3886_s3, %s2843_s13  ;;  %p2848_p4 = scmp.lt.u32.totalorder %s3886_s3, %s4011_s10 }
 0x646   : > { %p2849_p10 = scmp.lt.u32.totalorder %s2847_s20, %s2843_s13  ;;  %p2851_p11 = scmp.lt.u32.totalorder %s2843_s13, %s3886_s3 }
 0x647   : > { %p2845_p1 = pnand %p2844_p9, %p4010_p6 }
 0x648   : > { %p2850_p13 = por %p2849_p10, %p2848_p4 }
 0x649   : > { %p2846_p3 = pneg %p2845_p1 }
 0x64a   : > { %p2852_p0 = por %p2851_p11, %p2850_p13 }
 0x64c   : > { %p2853_p5 = pnand %p2852_p0, %p2846_p3 }
 0x64e   : > { %2856 = shalt.err (!%p2853_p5)
}
 0x64f   : > { %s2977_s28 = smov 128   ;;  %s2978_s24 = smov 8  }
 0x650   : > { %2426 = dma.vmem_to_hbm [thread:$0]  (%p4010_p6), %s3888_s14, 512, %s3886_s3, %s1857_s9, %s2977_s28, %s2974_s21, %s2978_s24  }
 0x651 PF: > { %s4012_s11 = sld [smem:[#allocation21_spill]]  ;;  %s4013_s6 = sld [smem:[#allocation25_spill]] }
 0x652   : > { %p2463_p8 = scmp.ge.s32.totalorder %s2963_s7, 2 }
 0x657   : > { %s1910_s1 = sand.u32 1, %s4012_s11   ;;  %p4014_p12 = scmp.ne.s32.totalorder %s4013_s6, 0 }
 0x658   : > { %s1911_s13 = scalar_lea.sflag [#allocation6], %s1910_s1 }
 0x659   : > { %p2448_p2 = pnand %p2463_p8, %p4014_p12 }
 0x65b   : > { %2914 = dma.done.wait (!%p2448_p2), %s1911_s13, 512  }
 0x65c   : > { %2916 = vsyncadd (!%p2448_p2), %s1911_s13, 4294966784  ;;  %s1920_s18 = scalar_lea.sflag [#allocation15], %s1910_s1 }
 0x65d   : > { %2918 = dma.done.wait (!%p2448_p2), %s1920_s18, 4096  }
 0x65e   : > { %2920 = vsyncadd (!%p2448_p2), %s1920_s18, 4294963200  ;;  %s28_s7 = sadd.s32 1, %s2963_s7   ;;  %s4015_s21 = smov %s2927_s22 }
 0x65f   : > { %p25_p7 = scmp.ge.s32.totalorder %s28_s7, 6   ;;  %s4016_s22 = smov %s2931_s23 }
 0x660   : > { %s4017_s23 = smov %s3224_s12  ;;  %s4018_s24 = smov %s2939_s25 }
 0x661   : > { %s4019_s25 = smov %s2943_s26  ;;  %s4020_s26 = smov %s3221_s19 }
 0x662   : > { %s4021_s27 = smov %s2955_s29  ;;  %s4022_s28 = smov %s2959_s30 }
 0x663   : > { %s4023_s29 = smov %s4026_s15  ;;  %s4024_s30 = smov %s4030_s17 }
 0x664   :  { %27 = sbr.rel (!%p25_p7) target bundleno = 20 (0x14), region = 123 }
 0x66b   :  { %1925 = vsyncpa [#allocation5], 1 }
 0x66c   :  { %1927 = vsyncpa [#allocation5 + $0x1], 1 }
 0x66d   :  { %1928 = vsyncpa [#allocation8], 1 }
 0x66e   :  { %1929 = vsyncpa [#allocation11], 1 }
 0x66f   :  { %1930 = vsyncpa [#allocation6], 1 }
 0x670   :  { %1932 = vsyncpa [#allocation6 + $0x1], 1 }
 0x671   :  { %1933 = vsyncpa [#allocation15], 1 }
 0x672   :  { %1935 = vsyncpa [#allocation15 + $0x1], 1 }

</bundles_post_ra>
